<compile_context>
chip_gen: v7x
topology: tpu7x:2x2x1
jax: 0.10.0
libtpu: 0.0.40
codegen_flags: <defaults>
</compile_context>

<pallas_src>
import functools

import jax
import jax.numpy as jnp
from jax.experimental import pallas as pl
from jax.experimental.pallas import tpu as pltpu

NEG_SLOPE = 0.01          # LeakyReLU negative slope used as `nl`
DILATIONS = (1, 3, 9)     # EncBlock residual-unit dilations


def _leaky_relu(x):
    return jnp.where(x > 0, x, NEG_SLOPE * x)


def _round_up(x, m):
    return ((x + m - 1) // m) * m


# ----------------------------------------------------------------------------
# Fused Pallas kernel: 3 residual units + final strided conv, G samples/step
# ----------------------------------------------------------------------------
def enc_block_kernel(x_ref, wpd_ref, wc_ref, ssub_ref, o_ref, pad_ref, *,
                     stride, body_off):
    G, C, L = x_ref.shape
    Cout = o_ref.shape[1]
    K = 2 * stride
    cpad = stride - 1
    W = ssub_ref.shape[0]                  # dense (stride-1) conv width
    span = pad_ref.shape[1] // G           # per-sample pad-scratch span (128-aligned)

    # Lane-concatenated activation slab (C, G*L): every sample of this grid
    # step shares each GEMM, amortizing MXU weight pushes and per-step cost.
    act = jnp.concatenate([x_ref[g] for g in range(G)], axis=-1).astype(jnp.float32)

    def reverse_lanes(v):
        # Reverse the last axis of a tiny (C, p<=9) slice via an anti-diagonal
        # matmul (MXU is idle here); avoids relying on a lax.rev lowering.
        p = v.shape[-1]
        if p <= 1:
            return v
        i = jax.lax.broadcasted_iota(jnp.int32, (p, p), 0)
        j = jax.lax.broadcasted_iota(jnp.int32, (p, p), 1)
        anti = (i + j == p - 1).astype(jnp.float32)
        return jnp.dot(v, anti, preferred_element_type=jnp.float32)

    def write_padded(sample, g, p):
        # Reflect-pad `sample` (C, L) by p into sample g's pad-scratch region:
        # one lane-aligned wide body store + two wide edge stores.
        lo = g * span + body_off
        pad_ref[:, lo:lo + L] = sample
        pad_ref[:, lo - p:lo] = reverse_lanes(sample[:, 1:p + 1])
        pad_ref[:, lo + L:lo + L + p] = reverse_lanes(sample[:, L - 1 - p:L - 1])

    # ---- three residual units: act += leaky_relu((Wp@Wd) @ [tap0; act; tap2]) ----
    # (1x1 pointwise conv is folded into the dilated conv weights in glue; exact
    # because the reference applies no nonlinearity between the two convs.)
    for u, d in enumerate(DILATIONS):
        for g in range(G):
            write_padded(act[:, g * L:(g + 1) * L], g, d)
        tap0 = jnp.concatenate(
            [pad_ref[:, g * span + body_off - d:g * span + body_off - d + L]
             for g in range(G)], axis=-1)
        tap2 = jnp.concatenate(
            [pad_ref[:, g * span + body_off + d:g * span + body_off + d + L]
             for g in range(G)], axis=-1)
        taps = jnp.concatenate([tap0, act, tap2], axis=0)              # (3C, G*L)
        h = jnp.dot(wpd_ref[u], taps, preferred_element_type=jnp.float32)
        act = act + _leaky_relu(h)                                     # stays in f32 vregs

    # ---- final conv: kernel=2*stride, stride=stride, reflect pad=stride-1 ----
    # Dense (stride-1) conv GEMM per sample, then one batched stride-subsample
    # GEMM against the 0/1 selection matrix precomputed in glue.
    for g in range(G):
        write_padded(act[:, g * L:(g + 1) * L], g, cpad)
    denses = []
    for g in range(G):
        base = g * span + body_off - cpad
        patches = jnp.concatenate(
            [pad_ref[:, base + k:base + k + W] for k in range(K)], axis=0)   # (K*C, W)
        denses.append(jnp.dot(wc_ref[...], patches,
                              preferred_element_type=jnp.float32))           # (Cout, W)
    dense_all = jnp.concatenate(denses, axis=0)                              # (G*Cout, W)
    out_all = jnp.dot(dense_all, ssub_ref[...],
                      preferred_element_type=jnp.float32)                    # (G*Cout, Lout)
    for g in range(G):
        o_ref[g] = out_all[g * Cout:(g + 1) * Cout].astype(o_ref.dtype)


# ----------------------------------------------------------------------------
# Wrapper: weight folding (glue) + one pallas_call for the whole EncBlock
# ----------------------------------------------------------------------------
def enc_block_forward(x, params, stride, samples_per_step=None):
    N, C, L = x.shape
    w_conv = params["conv"]                                  # (Cout, C, 2*stride)
    Cout, _, K = w_conv.shape
    assert K == 2 * stride and stride >= 2
    assert L > 2 * max(DILATIONS), "reflect padding requires L > 2*max(dilation)"
    cpad = stride - 1
    Lout = (L + 2 * cpad - K) // stride + 1
    W = stride * (Lout - 1) + 1                              # dense-conv output width

    # Batch folding: amortize per-step overhead / MXU weight pushes across G
    # samples per step, but keep >= 2 grid steps when the batch allows it so
    # both v7x TensorCores stay busy.
    if samples_per_step is None:
        samples_per_step = N // 2 if (N >= 2 and N % 2 == 0) else N
    assert N % samples_per_step == 0
    G = samples_per_step
    steps = N // G

    # ---- weight folding (glue) ----
    # wpd[u] = Wp_u @ Wd_u_flat, with Wd_u_flat[:, k*C + c] = wd_u[:, c, k].
    wpd_all = jnp.stack(
        [jnp.dot(wp[:, :, 0],
                 jnp.concatenate([wd[:, :, k] for k in range(3)], axis=1))
         for (wd, wp) in params["residuals"]], axis=0)                        # (3, C, 3C)
    wc_flat = jnp.concatenate([w_conv[:, :, k] for k in range(K)], axis=1)    # (Cout, K*C)
    # 0/1 stride-subsample matrix, built once here (constant kernel operand).
    ssub = (jnp.arange(W)[:, None] ==
            stride * jnp.arange(Lout)[None, :]).astype(jnp.float32)           # (W, Lout)

    pmax = max(max(DILATIONS), cpad)
    body_off = _round_up(pmax, 128)                          # lane-aligned body start
    span = _round_up(body_off + L + pmax, 128)               # per-sample scratch span

    kernel = functools.partial(enc_block_kernel, stride=stride, body_off=body_off)
    return pl.pallas_call(
        kernel,
        out_shape=jax.ShapeDtypeStruct((N, Cout, Lout), x.dtype),
        grid=(steps,),
        in_specs=[
            pl.BlockSpec((G, C, L), lambda n: (n, 0, 0)),          # activations
            pl.BlockSpec((3, C, 3 * C), lambda n: (0, 0, 0)),      # folded residual weights
            pl.BlockSpec((Cout, K * C), lambda n: (0, 0)),         # strided-conv weights
            pl.BlockSpec((W, Lout), lambda n: (0, 0)),             # stride-subsample 0/1
        ],
        out_specs=pl.BlockSpec((G, Cout, Lout), lambda n: (n, 0, 0)),
        scratch_shapes=[pltpu.VMEM((C, G * span), jnp.float32)],   # reflect-pad buffer
        compiler_params=pltpu.CompilerParams(dimension_semantics=("parallel",)),
    )(x, wpd_all, wc_flat, ssub)


# ----------------------------------------------------------------------------
# Parameter init (deterministic, weight-norm parameterization)
# ----------------------------------------------------------------------------
def _weight_norm(v, g):
    norm = jnp.sqrt(jnp.sum(v * v, axis=(1, 2), keepdims=True))
    return (g[:, None, None] * v) / norm


def init_enc_block_params(key, out_channels, stride):
    C = out_channels // 2
    keys = jax.random.split(key, 16)
    ki = iter(range(16))
    residuals = []
    for _ in range(3):
        v_dil = jax.random.normal(keys[next(ki)], (C, C, 3), jnp.float32) * 0.3
        g_dil = 1.0 + 0.1 * jax.random.normal(keys[next(ki)], (C,), jnp.float32)
        v_pw = jax.random.normal(keys[next(ki)], (C, C, 1), jnp.float32) * 0.3
        g_pw = 1.0 + 0.1 * jax.random.normal(keys[next(ki)], (C,), jnp.float32)
        residuals.append((_weight_norm(v_dil, g_dil), _weight_norm(v_pw, g_pw)))
    v_conv = jax.random.normal(
        keys[next(ki)], (out_channels, C, 2 * stride), jnp.float32) * 0.3
    g_conv = 1.0 + 0.1 * jax.random.normal(keys[next(ki)], (out_channels,), jnp.float32)
    return {"residuals": residuals, "conv": _weight_norm(v_conv, g_conv)}


# ----------------------------------------------------------------------------
# Plain-JAX reference for verification
# ----------------------------------------------------------------------------
def _ref_residual_unit(x, w_dil, w_pw, d):
    L = x.shape[-1]
    xp = jnp.pad(x, ((0, 0), (0, 0), (d, d)), mode="reflect")
    h = jnp.zeros(x.shape, jnp.float32)
    for k in range(3):
        h = h + jnp.einsum("oc,ncl->nol", w_dil[:, :, k], xp[:, :, k * d:k * d + L])
    h2 = jnp.einsum("oc,ncl->nol", w_pw[:, :, 0], h)
    return x + _leaky_relu(h2)


def _ref_enc_block(x, params, stride):
    out = x
    for (w_dil, w_pw), d in zip(params["residuals"], DILATIONS):
        out = _ref_residual_unit(out, w_dil, w_pw, d)
    w = params["conv"]
    Cout, C, K = w.shape
    pad = stride - 1
    xp = jnp.pad(out, ((0, 0), (0, 0), (pad, pad)), mode="reflect")
    L_out = (xp.shape[-1] - K) // stride + 1
    y = jnp.zeros((x.shape[0], Cout, L_out), jnp.float32)
    for k in range(K):
        tap = xp[:, :, k:k + stride * (L_out - 1) + 1:stride]
        y = y + jnp.einsum("oc,ncl->nol", w[:, :, k], tap)
    return y


# ----------------------------------------------------------------------------
if __name__ == "__main__":
    key = jax.random.PRNGKey(0)
    k_par, k_x = jax.random.split(key)

    N = 4                   # grid=(2,) with 2 samples folded per step
    out_channels = 16       # residual channels C = 8 -> one full sublane tile
    stride = 2
    L = 256                 # lane-dense: L and L//stride are multiples of 128

    params = init_enc_block_params(k_par, out_channels, stride)
    x = jax.random.normal(k_x, (N, out_channels // 2, L), jnp.float32)

    y = jax.block_until_ready(enc_block_forward(x, params, stride))
    assert y.shape == (N, out_channels, L // stride), y.shape

    y_ref = _ref_enc_block(x, params, stride)
    assert jnp.allclose(y, y_ref, atol=1e-4, rtol=1e-4), float(
        jnp.max(jnp.abs(y - y_ref)))

    print("KERNEL_OK")
</pallas_src>

<mosaic_0001>
module attributes {stable_mosaic.version = 11 : i64} {
  func.func @enc_block_kernel(%arg0: i32, %arg1: memref<2x8x256xf32, #tpu.memory_space<vmem>>, %arg2: memref<3x8x24xf32, #tpu.memory_space<vmem>>, %arg3: memref<16x32xf32, #tpu.memory_space<vmem>>, %arg4: memref<255x128xf32, #tpu.memory_space<vmem>>, %arg5: memref<2x16x128xf32, #tpu.memory_space<vmem>>, %arg6: memref<8x1024xf32, #tpu.memory_space<vmem>>) attributes {dimension_semantics = [#tpu.dimension_semantics<parallel>], iteration_bounds = array<i64: 2>, scalar_prefetch = 0 : i64, scratch_operands = 1 : i64, tpu.core_type = #tpu.core_type<tc>, window_params = [{transform_indices = @transform_0, window_bounds = array<i64: 2, 8, 256>}, {pipeline_mode = #tpu.pipeline_mode<synchronous>, transform_indices = @transform_1, window_bounds = array<i64: 3, 8, 24>}, {pipeline_mode = #tpu.pipeline_mode<synchronous>, transform_indices = @transform_2, window_bounds = array<i64: 16, 32>}, {pipeline_mode = #tpu.pipeline_mode<synchronous>, transform_indices = @transform_3, window_bounds = array<i64: 255, 128>}, {transform_indices = @transform_4, window_bounds = array<i64: 2, 16, 128>}]} {
    %c0 = arith.constant 0 : index
    %c0_0 = arith.constant 0 : index
    %c0_1 = arith.constant 0 : index
    %0 = vector.load %arg1[%c0, %c0_0, %c0_1] : memref<2x8x256xf32, #tpu.memory_space<vmem>>, vector<1x8x256xf32>
    %1 = vector.shape_cast %0 : vector<1x8x256xf32> to vector<8x256xf32>
    %c1 = arith.constant 1 : index
    %c0_2 = arith.constant 0 : index
    %c0_3 = arith.constant 0 : index
    %2 = vector.load %arg1[%c1, %c0_2, %c0_3] : memref<2x8x256xf32, #tpu.memory_space<vmem>>, vector<1x8x256xf32>
    %3 = vector.shape_cast %2 : vector<1x8x256xf32> to vector<8x256xf32>
    %4 = tpu.concatenate %1, %3 in 1 : vector<8x256xf32>, vector<8x256xf32> -> vector<8x512xf32>
    %5 = vector.extract_strided_slice %4 {offsets = [0, 0], sizes = [8, 256], strides = [1, 1]} : vector<8x512xf32> to vector<8x256xf32>
    %c0_4 = arith.constant 0 : index
    %c128 = arith.constant 128 : index
    %6 = vector.load %arg6[%c0_4, %c128] : memref<8x1024xf32, #tpu.memory_space<vmem>>, vector<8x256xf32>
    tpu.vector_store %arg6[%c0_4, %c128], %5 {strides = array<i32>} : memref<8x1024xf32, #tpu.memory_space<vmem>>, vector<8x256xf32>,
    %7 = vector.extract_strided_slice %5 {offsets = [0, 1], sizes = [8, 1], strides = [1, 1]} : vector<8x256xf32> to vector<8x1xf32>
    %c0_5 = arith.constant 0 : index
    %c127 = arith.constant 127 : index
    %8 = vector.load %arg6[%c0_5, %c127] : memref<8x1024xf32, #tpu.memory_space<vmem>>, vector<8x1xf32>
    tpu.vector_store %arg6[%c0_5, %c127], %7 {strides = array<i32>} : memref<8x1024xf32, #tpu.memory_space<vmem>>, vector<8x1xf32>,
    %9 = vector.extract_strided_slice %5 {offsets = [0, 254], sizes = [8, 1], strides = [1, 1]} : vector<8x256xf32> to vector<8x1xf32>
    %c0_6 = arith.constant 0 : index
    %c384 = arith.constant 384 : index
    %10 = vector.load %arg6[%c0_6, %c384] : memref<8x1024xf32, #tpu.memory_space<vmem>>, vector<8x1xf32>
    tpu.vector_store %arg6[%c0_6, %c384], %9 {strides = array<i32>} : memref<8x1024xf32, #tpu.memory_space<vmem>>, vector<8x1xf32>,
    %11 = vector.extract_strided_slice %4 {offsets = [0, 256], sizes = [8, 256], strides = [1, 1]} : vector<8x512xf32> to vector<8x256xf32>
    %c0_7 = arith.constant 0 : index
    %c640 = arith.constant 640 : index
    %12 = vector.load %arg6[%c0_7, %c640] : memref<8x1024xf32, #tpu.memory_space<vmem>>, vector<8x256xf32>
    tpu.vector_store %arg6[%c0_7, %c640], %11 {strides = array<i32>} : memref<8x1024xf32, #tpu.memory_space<vmem>>, vector<8x256xf32>,
    %13 = vector.extract_strided_slice %11 {offsets = [0, 1], sizes = [8, 1], strides = [1, 1]} : vector<8x256xf32> to vector<8x1xf32>
    %c0_8 = arith.constant 0 : index
    %c639 = arith.constant 639 : index
    %14 = vector.load %arg6[%c0_8, %c639] : memref<8x1024xf32, #tpu.memory_space<vmem>>, vector<8x1xf32>
    tpu.vector_store %arg6[%c0_8, %c639], %13 {strides = array<i32>} : memref<8x1024xf32, #tpu.memory_space<vmem>>, vector<8x1xf32>,
    %15 = vector.extract_strided_slice %11 {offsets = [0, 254], sizes = [8, 1], strides = [1, 1]} : vector<8x256xf32> to vector<8x1xf32>
    %c0_9 = arith.constant 0 : index
    %c896 = arith.constant 896 : index
    %16 = vector.load %arg6[%c0_9, %c896] : memref<8x1024xf32, #tpu.memory_space<vmem>>, vector<8x1xf32>
    tpu.vector_store %arg6[%c0_9, %c896], %15 {strides = array<i32>} : memref<8x1024xf32, #tpu.memory_space<vmem>>, vector<8x1xf32>,
    %c0_10 = arith.constant 0 : index
    %c127_11 = arith.constant 127 : index
    %17 = vector.load %arg6[%c0_10, %c127_11] : memref<8x1024xf32, #tpu.memory_space<vmem>>, vector<8x256xf32>
    %c0_12 = arith.constant 0 : index
    %c639_13 = arith.constant 639 : index
    %18 = vector.load %arg6[%c0_12, %c639_13] : memref<8x1024xf32, #tpu.memory_space<vmem>>, vector<8x256xf32>
    %19 = tpu.concatenate %17, %18 in 1 : vector<8x256xf32>, vector<8x256xf32> -> vector<8x512xf32>
    %c0_14 = arith.constant 0 : index
    %c129 = arith.constant 129 : index
    %20 = vector.load %arg6[%c0_14, %c129] : memref<8x1024xf32, #tpu.memory_space<vmem>>, vector<8x256xf32>
    %c0_15 = arith.constant 0 : index
    %c641 = arith.constant 641 : index
    %21 = vector.load %arg6[%c0_15, %c641] : memref<8x1024xf32, #tpu.memory_space<vmem>>, vector<8x256xf32>
    %22 = tpu.concatenate %20, %21 in 1 : vector<8x256xf32>, vector<8x256xf32> -> vector<8x512xf32>
    %23 = tpu.concatenate %19, %4, %22 in 0 : vector<8x512xf32>, vector<8x512xf32>, vector<8x512xf32> -> vector<24x512xf32>
    %c0_16 = arith.constant 0 : index
    %c0_17 = arith.constant 0 : index
    %c0_18 = arith.constant 0 : index
    %24 = vector.load %arg2[%c0_16, %c0_17, %c0_18] : memref<3x8x24xf32, #tpu.memory_space<vmem>>, vector<1x8x24xf32>
    %25 = vector.shape_cast %24 : vector<1x8x24xf32> to vector<8x24xf32>
    %cst = arith.constant dense<0.000000e+00> : vector<8x512xf32>
    %26 = tpu.matmul %25, %23, %cst {dimension_numbers = #tpu.dot_dimension_numbers<[1], [0], [0], [1], [0, 0, 1, 1], [], []>} : vector<8x24xf32>, vector<24x512xf32>, vector<8x512xf32> -> vector<8x512xf32>
    %cst_19 = arith.constant 0.000000e+00 : f32
    %27 = vector.broadcast %cst_19 : f32 to vector<8x512xf32>
    %28 = arith.cmpf ogt, %26, %27 : vector<8x512xf32>
    %cst_20 = arith.constant 0.00999999977 : f32
    %29 = vector.broadcast %cst_20 : f32 to vector<8x512xf32>
    %30 = arith.mulf %29, %26 : vector<8x512xf32>
    %31 = arith.select %28, %26, %30 : vector<8x512xi1>, vector<8x512xf32>
    %32 = arith.addf %4, %31 : vector<8x512xf32>
    %33 = vector.extract_strided_slice %32 {offsets = [0, 0], sizes = [8, 256], strides = [1, 1]} : vector<8x512xf32> to vector<8x256xf32>
    %c0_21 = arith.constant 0 : index
    %c128_22 = arith.constant 128 : index
    %34 = vector.load %arg6[%c0_21, %c128_22] : memref<8x1024xf32, #tpu.memory_space<vmem>>, vector<8x256xf32>
    tpu.vector_store %arg6[%c0_21, %c128_22], %33 {strides = array<i32>} : memref<8x1024xf32, #tpu.memory_space<vmem>>, vector<8x256xf32>,
    %35 = vector.extract_strided_slice %33 {offsets = [0, 1], sizes = [8, 3], strides = [1, 1]} : vector<8x256xf32> to vector<8x3xf32>
    %36 = tpu.iota {dimensions = array<i32: 0>} : vector<3x3xi32>
    %37 = tpu.iota {dimensions = array<i32: 1>} : vector<3x3xi32>
    %38 = arith.addi %36, %37 : vector<3x3xi32>
    %c2_i32 = arith.constant 2 : i32
    %39 = vector.broadcast %c2_i32 : i32 to vector<3x3xi32>
    %40 = arith.cmpi eq, %38, %39 : vector<3x3xi32>
    %41 = arith.extui %40 : vector<3x3xi1> to vector<3x3xi32>
    %42 = arith.sitofp %41 : vector<3x3xi32> to vector<3x3xf32>
    %cst_23 = arith.constant dense<0.000000e+00> : vector<8x3xf32>
    %43 = tpu.matmul %35, %42, %cst_23 {dimension_numbers = #tpu.dot_dimension_numbers<[1], [0], [0], [1], [0, 0, 1, 1], [], []>} : vector<8x3xf32>, vector<3x3xf32>, vector<8x3xf32> -> vector<8x3xf32>
    %c0_24 = arith.constant 0 : index
    %c125 = arith.constant 125 : index
    %44 = vector.load %arg6[%c0_24, %c125] : memref<8x1024xf32, #tpu.memory_space<vmem>>, vector<8x3xf32>
    tpu.vector_store %arg6[%c0_24, %c125], %43 {strides = array<i32>} : memref<8x1024xf32, #tpu.memory_space<vmem>>, vector<8x3xf32>,
    %45 = vector.extract_strided_slice %33 {offsets = [0, 252], sizes = [8, 3], strides = [1, 1]} : vector<8x256xf32> to vector<8x3xf32>
    %46 = tpu.iota {dimensions = array<i32: 0>} : vector<3x3xi32>
    %47 = tpu.iota {dimensions = array<i32: 1>} : vector<3x3xi32>
    %48 = arith.addi %46, %47 : vector<3x3xi32>
    %c2_i32_25 = arith.constant 2 : i32
    %49 = vector.broadcast %c2_i32_25 : i32 to vector<3x3xi32>
    %50 = arith.cmpi eq, %48, %49 : vector<3x3xi32>
    %51 = arith.extui %50 : vector<3x3xi1> to vector<3x3xi32>
    %52 = arith.sitofp %51 : vector<3x3xi32> to vector<3x3xf32>
    %cst_26 = arith.constant dense<0.000000e+00> : vector<8x3xf32>
    %53 = tpu.matmul %45, %52, %cst_26 {dimension_numbers = #tpu.dot_dimension_numbers<[1], [0], [0], [1], [0, 0, 1, 1], [], []>} : vector<8x3xf32>, vector<3x3xf32>, vector<8x3xf32> -> vector<8x3xf32>
    %c0_27 = arith.constant 0 : index
    %c384_28 = arith.constant 384 : index
    %54 = vector.load %arg6[%c0_27, %c384_28] : memref<8x1024xf32, #tpu.memory_space<vmem>>, vector<8x3xf32>
    tpu.vector_store %arg6[%c0_27, %c384_28], %53 {strides = array<i32>} : memref<8x1024xf32, #tpu.memory_space<vmem>>, vector<8x3xf32>,
    %55 = vector.extract_strided_slice %32 {offsets = [0, 256], sizes = [8, 256], strides = [1, 1]} : vector<8x512xf32> to vector<8x256xf32>
    %c0_29 = arith.constant 0 : index
    %c640_30 = arith.constant 640 : index
    %56 = vector.load %arg6[%c0_29, %c640_30] : memref<8x1024xf32, #tpu.memory_space<vmem>>, vector<8x256xf32>
    tpu.vector_store %arg6[%c0_29, %c640_30], %55 {strides = array<i32>} : memref<8x1024xf32, #tpu.memory_space<vmem>>, vector<8x256xf32>,
    %57 = vector.extract_strided_slice %55 {offsets = [0, 1], sizes = [8, 3], strides = [1, 1]} : vector<8x256xf32> to vector<8x3xf32>
    %58 = tpu.iota {dimensions = array<i32: 0>} : vector<3x3xi32>
    %59 = tpu.iota {dimensions = array<i32: 1>} : vector<3x3xi32>
    %60 = arith.addi %58, %59 : vector<3x3xi32>
    %c2_i32_31 = arith.constant 2 : i32
    %61 = vector.broadcast %c2_i32_31 : i32 to vector<3x3xi32>
    %62 = arith.cmpi eq, %60, %61 : vector<3x3xi32>
    %63 = arith.extui %62 : vector<3x3xi1> to vector<3x3xi32>
    %64 = arith.sitofp %63 : vector<3x3xi32> to vector<3x3xf32>
    %cst_32 = arith.constant dense<0.000000e+00> : vector<8x3xf32>
    %65 = tpu.matmul %57, %64, %cst_32 {dimension_numbers = #tpu.dot_dimension_numbers<[1], [0], [0], [1], [0, 0, 1, 1], [], []>} : vector<8x3xf32>, vector<3x3xf32>, vector<8x3xf32> -> vector<8x3xf32>
    %c0_33 = arith.constant 0 : index
    %c637 = arith.constant 637 : index
    %66 = vector.load %arg6[%c0_33, %c637] : memref<8x1024xf32, #tpu.memory_space<vmem>>, vector<8x3xf32>
    tpu.vector_store %arg6[%c0_33, %c637], %65 {strides = array<i32>} : memref<8x1024xf32, #tpu.memory_space<vmem>>, vector<8x3xf32>,
    %67 = vector.extract_strided_slice %55 {offsets = [0, 252], sizes = [8, 3], strides = [1, 1]} : vector<8x256xf32> to vector<8x3xf32>
    %68 = tpu.iota {dimensions = array<i32: 0>} : vector<3x3xi32>
    %69 = tpu.iota {dimensions = array<i32: 1>} : vector<3x3xi32>
    %70 = arith.addi %68, %69 : vector<3x3xi32>
    %c2_i32_34 = arith.constant 2 : i32
    %71 = vector.broadcast %c2_i32_34 : i32 to vector<3x3xi32>
    %72 = arith.cmpi eq, %70, %71 : vector<3x3xi32>
    %73 = arith.extui %72 : vector<3x3xi1> to vector<3x3xi32>
    %74 = arith.sitofp %73 : vector<3x3xi32> to vector<3x3xf32>
    %cst_35 = arith.constant dense<0.000000e+00> : vector<8x3xf32>
    %75 = tpu.matmul %67, %74, %cst_35 {dimension_numbers = #tpu.dot_dimension_numbers<[1], [0], [0], [1], [0, 0, 1, 1], [], []>} : vector<8x3xf32>, vector<3x3xf32>, vector<8x3xf32> -> vector<8x3xf32>
    %c0_36 = arith.constant 0 : index
    %c896_37 = arith.constant 896 : index
    %76 = vector.load %arg6[%c0_36, %c896_37] : memref<8x1024xf32, #tpu.memory_space<vmem>>, vector<8x3xf32>
    tpu.vector_store %arg6[%c0_36, %c896_37], %75 {strides = array<i32>} : memref<8x1024xf32, #tpu.memory_space<vmem>>, vector<8x3xf32>,
    %c0_38 = arith.constant 0 : index
    %c125_39 = arith.constant 125 : index
    %77 = vector.load %arg6[%c0_38, %c125_39] : memref<8x1024xf32, #tpu.memory_space<vmem>>, vector<8x256xf32>
    %c0_40 = arith.constant 0 : index
    %c637_41 = arith.constant 637 : index
    %78 = vector.load %arg6[%c0_40, %c637_41] : memref<8x1024xf32, #tpu.memory_space<vmem>>, vector<8x256xf32>
    %79 = tpu.concatenate %77, %78 in 1 : vector<8x256xf32>, vector<8x256xf32> -> vector<8x512xf32>
    %c0_42 = arith.constant 0 : index
    %c131 = arith.constant 131 : index
    %80 = vector.load %arg6[%c0_42, %c131] : memref<8x1024xf32, #tpu.memory_space<vmem>>, vector<8x256xf32>
    %c0_43 = arith.constant 0 : index
    %c643 = arith.constant 643 : index
    %81 = vector.load %arg6[%c0_43, %c643] : memref<8x1024xf32, #tpu.memory_space<vmem>>, vector<8x256xf32>
    %82 = tpu.concatenate %80, %81 in 1 : vector<8x256xf32>, vector<8x256xf32> -> vector<8x512xf32>
    %83 = tpu.concatenate %79, %32, %82 in 0 : vector<8x512xf32>, vector<8x512xf32>, vector<8x512xf32> -> vector<24x512xf32>
    %c1_44 = arith.constant 1 : index
    %c0_45 = arith.constant 0 : index
    %c0_46 = arith.constant 0 : index
    %84 = vector.load %arg2[%c1_44, %c0_45, %c0_46] : memref<3x8x24xf32, #tpu.memory_space<vmem>>, vector<1x8x24xf32>
    %85 = vector.shape_cast %84 : vector<1x8x24xf32> to vector<8x24xf32>
    %cst_47 = arith.constant dense<0.000000e+00> : vector<8x512xf32>
    %86 = tpu.matmul %85, %83, %cst_47 {dimension_numbers = #tpu.dot_dimension_numbers<[1], [0], [0], [1], [0, 0, 1, 1], [], []>} : vector<8x24xf32>, vector<24x512xf32>, vector<8x512xf32> -> vector<8x512xf32>
    %cst_48 = arith.constant 0.000000e+00 : f32
    %87 = vector.broadcast %cst_48 : f32 to vector<8x512xf32>
    %88 = arith.cmpf ogt, %86, %87 : vector<8x512xf32>
    %cst_49 = arith.constant 0.00999999977 : f32
    %89 = vector.broadcast %cst_49 : f32 to vector<8x512xf32>
    %90 = arith.mulf %89, %86 : vector<8x512xf32>
    %91 = arith.select %88, %86, %90 : vector<8x512xi1>, vector<8x512xf32>
    %92 = arith.addf %32, %91 : vector<8x512xf32>
    %93 = vector.extract_strided_slice %92 {offsets = [0, 0], sizes = [8, 256], strides = [1, 1]} : vector<8x512xf32> to vector<8x256xf32>
    %c0_50 = arith.constant 0 : index
    %c128_51 = arith.constant 128 : index
    %94 = vector.load %arg6[%c0_50, %c128_51] : memref<8x1024xf32, #tpu.memory_space<vmem>>, vector<8x256xf32>
    tpu.vector_store %arg6[%c0_50, %c128_51], %93 {strides = array<i32>} : memref<8x1024xf32, #tpu.memory_space<vmem>>, vector<8x256xf32>,
    %95 = vector.extract_strided_slice %93 {offsets = [0, 1], sizes = [8, 9], strides = [1, 1]} : vector<8x256xf32> to vector<8x9xf32>
    %96 = tpu.iota {dimensions = array<i32: 0>} : vector<9x9xi32>
    %97 = tpu.iota {dimensions = array<i32: 1>} : vector<9x9xi32>
    %98 = arith.addi %96, %97 : vector<9x9xi32>
    %c8_i32 = arith.constant 8 : i32
    %99 = vector.broadcast %c8_i32 : i32 to vector<9x9xi32>
    %100 = arith.cmpi eq, %98, %99 : vector<9x9xi32>
    %101 = arith.extui %100 : vector<9x9xi1> to vector<9x9xi32>
    %102 = arith.sitofp %101 : vector<9x9xi32> to vector<9x9xf32>
    %cst_52 = arith.constant dense<0.000000e+00> : vector<8x9xf32>
    %103 = tpu.matmul %95, %102, %cst_52 {dimension_numbers = #tpu.dot_dimension_numbers<[1], [0], [0], [1], [0, 0, 1, 1], [], []>} : vector<8x9xf32>, vector<9x9xf32>, vector<8x9xf32> -> vector<8x9xf32>
    %c0_53 = arith.constant 0 : index
    %c119 = arith.constant 119 : index
    %104 = vector.load %arg6[%c0_53, %c119] : memref<8x1024xf32, #tpu.memory_space<vmem>>, vector<8x9xf32>
    tpu.vector_store %arg6[%c0_53, %c119], %103 {strides = array<i32>} : memref<8x1024xf32, #tpu.memory_space<vmem>>, vector<8x9xf32>,
    %105 = vector.extract_strided_slice %93 {offsets = [0, 246], sizes = [8, 9], strides = [1, 1]} : vector<8x256xf32> to vector<8x9xf32>
    %106 = tpu.iota {dimensions = array<i32: 0>} : vector<9x9xi32>
    %107 = tpu.iota {dimensions = array<i32: 1>} : vector<9x9xi32>
    %108 = arith.addi %106, %107 : vector<9x9xi32>
    %c8_i32_54 = arith.constant 8 : i32
    %109 = vector.broadcast %c8_i32_54 : i32 to vector<9x9xi32>
    %110 = arith.cmpi eq, %108, %109 : vector<9x9xi32>
    %111 = arith.extui %110 : vector<9x9xi1> to vector<9x9xi32>
    %112 = arith.sitofp %111 : vector<9x9xi32> to vector<9x9xf32>
    %cst_55 = arith.constant dense<0.000000e+00> : vector<8x9xf32>
    %113 = tpu.matmul %105, %112, %cst_55 {dimension_numbers = #tpu.dot_dimension_numbers<[1], [0], [0], [1], [0, 0, 1, 1], [], []>} : vector<8x9xf32>, vector<9x9xf32>, vector<8x9xf32> -> vector<8x9xf32>
    %c0_56 = arith.constant 0 : index
    %c384_57 = arith.constant 384 : index
    %114 = vector.load %arg6[%c0_56, %c384_57] : memref<8x1024xf32, #tpu.memory_space<vmem>>, vector<8x9xf32>
    tpu.vector_store %arg6[%c0_56, %c384_57], %113 {strides = array<i32>} : memref<8x1024xf32, #tpu.memory_space<vmem>>, vector<8x9xf32>,
    %115 = vector.extract_strided_slice %92 {offsets = [0, 256], sizes = [8, 256], strides = [1, 1]} : vector<8x512xf32> to vector<8x256xf32>
    %c0_58 = arith.constant 0 : index
    %c640_59 = arith.constant 640 : index
    %116 = vector.load %arg6[%c0_58, %c640_59] : memref<8x1024xf32, #tpu.memory_space<vmem>>, vector<8x256xf32>
    tpu.vector_store %arg6[%c0_58, %c640_59], %115 {strides = array<i32>} : memref<8x1024xf32, #tpu.memory_space<vmem>>, vector<8x256xf32>,
    %117 = vector.extract_strided_slice %115 {offsets = [0, 1], sizes = [8, 9], strides = [1, 1]} : vector<8x256xf32> to vector<8x9xf32>
    %118 = tpu.iota {dimensions = array<i32: 0>} : vector<9x9xi32>
    %119 = tpu.iota {dimensions = array<i32: 1>} : vector<9x9xi32>
    %120 = arith.addi %118, %119 : vector<9x9xi32>
    %c8_i32_60 = arith.constant 8 : i32
    %121 = vector.broadcast %c8_i32_60 : i32 to vector<9x9xi32>
    %122 = arith.cmpi eq, %120, %121 : vector<9x9xi32>
    %123 = arith.extui %122 : vector<9x9xi1> to vector<9x9xi32>
    %124 = arith.sitofp %123 : vector<9x9xi32> to vector<9x9xf32>
    %cst_61 = arith.constant dense<0.000000e+00> : vector<8x9xf32>
    %125 = tpu.matmul %117, %124, %cst_61 {dimension_numbers = #tpu.dot_dimension_numbers<[1], [0], [0], [1], [0, 0, 1, 1], [], []>} : vector<8x9xf32>, vector<9x9xf32>, vector<8x9xf32> -> vector<8x9xf32>
    %c0_62 = arith.constant 0 : index
    %c631 = arith.constant 631 : index
    %126 = vector.load %arg6[%c0_62, %c631] : memref<8x1024xf32, #tpu.memory_space<vmem>>, vector<8x9xf32>
    tpu.vector_store %arg6[%c0_62, %c631], %125 {strides = array<i32>} : memref<8x1024xf32, #tpu.memory_space<vmem>>, vector<8x9xf32>,
    %127 = vector.extract_strided_slice %115 {offsets = [0, 246], sizes = [8, 9], strides = [1, 1]} : vector<8x256xf32> to vector<8x9xf32>
    %128 = tpu.iota {dimensions = array<i32: 0>} : vector<9x9xi32>
    %129 = tpu.iota {dimensions = array<i32: 1>} : vector<9x9xi32>
    %130 = arith.addi %128, %129 : vector<9x9xi32>
    %c8_i32_63 = arith.constant 8 : i32
    %131 = vector.broadcast %c8_i32_63 : i32 to vector<9x9xi32>
    %132 = arith.cmpi eq, %130, %131 : vector<9x9xi32>
    %133 = arith.extui %132 : vector<9x9xi1> to vector<9x9xi32>
    %134 = arith.sitofp %133 : vector<9x9xi32> to vector<9x9xf32>
    %cst_64 = arith.constant dense<0.000000e+00> : vector<8x9xf32>
    %135 = tpu.matmul %127, %134, %cst_64 {dimension_numbers = #tpu.dot_dimension_numbers<[1], [0], [0], [1], [0, 0, 1, 1], [], []>} : vector<8x9xf32>, vector<9x9xf32>, vector<8x9xf32> -> vector<8x9xf32>
    %c0_65 = arith.constant 0 : index
    %c896_66 = arith.constant 896 : index
    %136 = vector.load %arg6[%c0_65, %c896_66] : memref<8x1024xf32, #tpu.memory_space<vmem>>, vector<8x9xf32>
    tpu.vector_store %arg6[%c0_65, %c896_66], %135 {strides = array<i32>} : memref<8x1024xf32, #tpu.memory_space<vmem>>, vector<8x9xf32>,
    %c0_67 = arith.constant 0 : index
    %c119_68 = arith.constant 119 : index
    %137 = vector.load %arg6[%c0_67, %c119_68] : memref<8x1024xf32, #tpu.memory_space<vmem>>, vector<8x256xf32>
    %c0_69 = arith.constant 0 : index
    %c631_70 = arith.constant 631 : index
    %138 = vector.load %arg6[%c0_69, %c631_70] : memref<8x1024xf32, #tpu.memory_space<vmem>>, vector<8x256xf32>
    %139 = tpu.concatenate %137, %138 in 1 : vector<8x256xf32>, vector<8x256xf32> -> vector<8x512xf32>
    %c0_71 = arith.constant 0 : index
    %c137 = arith.constant 137 : index
    %140 = vector.load %arg6[%c0_71, %c137] : memref<8x1024xf32, #tpu.memory_space<vmem>>, vector<8x256xf32>
    %c0_72 = arith.constant 0 : index
    %c649 = arith.constant 649 : index
    %141 = vector.load %arg6[%c0_72, %c649] : memref<8x1024xf32, #tpu.memory_space<vmem>>, vector<8x256xf32>
    %142 = tpu.concatenate %140, %141 in 1 : vector<8x256xf32>, vector<8x256xf32> -> vector<8x512xf32>
    %143 = tpu.concatenate %139, %92, %142 in 0 : vector<8x512xf32>, vector<8x512xf32>, vector<8x512xf32> -> vector<24x512xf32>
    %c2 = arith.constant 2 : index
    %c0_73 = arith.constant 0 : index
    %c0_74 = arith.constant 0 : index
    %144 = vector.load %arg2[%c2, %c0_73, %c0_74] : memref<3x8x24xf32, #tpu.memory_space<vmem>>, vector<1x8x24xf32>
    %145 = vector.shape_cast %144 : vector<1x8x24xf32> to vector<8x24xf32>
    %cst_75 = arith.constant dense<0.000000e+00> : vector<8x512xf32>
    %146 = tpu.matmul %145, %143, %cst_75 {dimension_numbers = #tpu.dot_dimension_numbers<[1], [0], [0], [1], [0, 0, 1, 1], [], []>} : vector<8x24xf32>, vector<24x512xf32>, vector<8x512xf32> -> vector<8x512xf32>
    %cst_76 = arith.constant 0.000000e+00 : f32
    %147 = vector.broadcast %cst_76 : f32 to vector<8x512xf32>
    %148 = arith.cmpf ogt, %146, %147 : vector<8x512xf32>
    %cst_77 = arith.constant 0.00999999977 : f32
    %149 = vector.broadcast %cst_77 : f32 to vector<8x512xf32>
    %150 = arith.mulf %149, %146 : vector<8x512xf32>
    %151 = arith.select %148, %146, %150 : vector<8x512xi1>, vector<8x512xf32>
    %152 = arith.addf %92, %151 : vector<8x512xf32>
    %153 = vector.extract_strided_slice %152 {offsets = [0, 0], sizes = [8, 256], strides = [1, 1]} : vector<8x512xf32> to vector<8x256xf32>
    %c0_78 = arith.constant 0 : index
    %c128_79 = arith.constant 128 : index
    %154 = vector.load %arg6[%c0_78, %c128_79] : memref<8x1024xf32, #tpu.memory_space<vmem>>, vector<8x256xf32>
    tpu.vector_store %arg6[%c0_78, %c128_79], %153 {strides = array<i32>} : memref<8x1024xf32, #tpu.memory_space<vmem>>, vector<8x256xf32>,
    %155 = vector.extract_strided_slice %153 {offsets = [0, 1], sizes = [8, 1], strides = [1, 1]} : vector<8x256xf32> to vector<8x1xf32>
    %c0_80 = arith.constant 0 : index
    %c127_81 = arith.constant 127 : index
    %156 = vector.load %arg6[%c0_80, %c127_81] : memref<8x1024xf32, #tpu.memory_space<vmem>>, vector<8x1xf32>
    tpu.vector_store %arg6[%c0_80, %c127_81], %155 {strides = array<i32>} : memref<8x1024xf32, #tpu.memory_space<vmem>>, vector<8x1xf32>,
    %157 = vector.extract_strided_slice %153 {offsets = [0, 254], sizes = [8, 1], strides = [1, 1]} : vector<8x256xf32> to vector<8x1xf32>
    %c0_82 = arith.constant 0 : index
    %c384_83 = arith.constant 384 : index
    %158 = vector.load %arg6[%c0_82, %c384_83] : memref<8x1024xf32, #tpu.memory_space<vmem>>, vector<8x1xf32>
    tpu.vector_store %arg6[%c0_82, %c384_83], %157 {strides = array<i32>} : memref<8x1024xf32, #tpu.memory_space<vmem>>, vector<8x1xf32>,
    %159 = vector.extract_strided_slice %152 {offsets = [0, 256], sizes = [8, 256], strides = [1, 1]} : vector<8x512xf32> to vector<8x256xf32>
    %c0_84 = arith.constant 0 : index
    %c640_85 = arith.constant 640 : index
    %160 = vector.load %arg6[%c0_84, %c640_85] : memref<8x1024xf32, #tpu.memory_space<vmem>>, vector<8x256xf32>
    tpu.vector_store %arg6[%c0_84, %c640_85], %159 {strides = array<i32>} : memref<8x1024xf32, #tpu.memory_space<vmem>>, vector<8x256xf32>,
    %161 = vector.extract_strided_slice %159 {offsets = [0, 1], sizes = [8, 1], strides = [1, 1]} : vector<8x256xf32> to vector<8x1xf32>
    %c0_86 = arith.constant 0 : index
    %c639_87 = arith.constant 639 : index
    %162 = vector.load %arg6[%c0_86, %c639_87] : memref<8x1024xf32, #tpu.memory_space<vmem>>, vector<8x1xf32>
    tpu.vector_store %arg6[%c0_86, %c639_87], %161 {strides = array<i32>} : memref<8x1024xf32, #tpu.memory_space<vmem>>, vector<8x1xf32>,
    %163 = vector.extract_strided_slice %159 {offsets = [0, 254], sizes = [8, 1], strides = [1, 1]} : vector<8x256xf32> to vector<8x1xf32>
    %c0_88 = arith.constant 0 : index
    %c896_89 = arith.constant 896 : index
    %164 = vector.load %arg6[%c0_88, %c896_89] : memref<8x1024xf32, #tpu.memory_space<vmem>>, vector<8x1xf32>
    tpu.vector_store %arg6[%c0_88, %c896_89], %163 {strides = array<i32>} : memref<8x1024xf32, #tpu.memory_space<vmem>>, vector<8x1xf32>,
    %c0_90 = arith.constant 0 : index
    %c127_91 = arith.constant 127 : index
    %165 = vector.load %arg6[%c0_90, %c127_91] : memref<8x1024xf32, #tpu.memory_space<vmem>>, vector<8x255xf32>
    %c0_92 = arith.constant 0 : index
    %c128_93 = arith.constant 128 : index
    %166 = vector.load %arg6[%c0_92, %c128_93] : memref<8x1024xf32, #tpu.memory_space<vmem>>, vector<8x255xf32>
    %c0_94 = arith.constant 0 : index
    %c129_95 = arith.constant 129 : index
    %167 = vector.load %arg6[%c0_94, %c129_95] : memref<8x1024xf32, #tpu.memory_space<vmem>>, vector<8x255xf32>
    %c0_96 = arith.constant 0 : index
    %c130 = arith.constant 130 : index
    %168 = vector.load %arg6[%c0_96, %c130] : memref<8x1024xf32, #tpu.memory_space<vmem>>, vector<8x255xf32>
    %169 = tpu.concatenate %165, %166, %167, %168 in 0 : vector<8x255xf32>, vector<8x255xf32>, vector<8x255xf32>, vector<8x255xf32> -> vector<32x255xf32>
    %c0_97 = arith.constant 0 : index
    %c0_98 = arith.constant 0 : index
    %170 = vector.load %arg3[%c0_97, %c0_98] : memref<16x32xf32, #tpu.memory_space<vmem>>, vector<16x32xf32>
    %cst_99 = arith.constant dense<0.000000e+00> : vector<16x255xf32>
    %171 = tpu.matmul %170, %169, %cst_99 {dimension_numbers = #tpu.dot_dimension_numbers<[1], [0], [0], [1], [0, 0, 1, 1], [], []>} : vector<16x32xf32>, vector<32x255xf32>, vector<16x255xf32> -> vector<16x255xf32>
    %c0_100 = arith.constant 0 : index
    %c639_101 = arith.constant 639 : index
    %172 = vector.load %arg6[%c0_100, %c639_101] : memref<8x1024xf32, #tpu.memory_space<vmem>>, vector<8x255xf32>
    %c0_102 = arith.constant 0 : index
    %c640_103 = arith.constant 640 : index
    %173 = vector.load %arg6[%c0_102, %c640_103] : memref<8x1024xf32, #tpu.memory_space<vmem>>, vector<8x255xf32>
    %c0_104 = arith.constant 0 : index
    %c641_105 = arith.constant 641 : index
    %174 = vector.load %arg6[%c0_104, %c641_105] : memref<8x1024xf32, #tpu.memory_space<vmem>>, vector<8x255xf32>
    %c0_106 = arith.constant 0 : index
    %c642 = arith.constant 642 : index
    %175 = vector.load %arg6[%c0_106, %c642] : memref<8x1024xf32, #tpu.memory_space<vmem>>, vector<8x255xf32>
    %176 = tpu.concatenate %172, %173, %174, %175 in 0 : vector<8x255xf32>, vector<8x255xf32>, vector<8x255xf32>, vector<8x255xf32> -> vector<32x255xf32>
    %c0_107 = arith.constant 0 : index
    %c0_108 = arith.constant 0 : index
    %177 = vector.load %arg3[%c0_107, %c0_108] : memref<16x32xf32, #tpu.memory_space<vmem>>, vector<16x32xf32>
    %cst_109 = arith.constant dense<0.000000e+00> : vector<16x255xf32>
    %178 = tpu.matmul %177, %176, %cst_109 {dimension_numbers = #tpu.dot_dimension_numbers<[1], [0], [0], [1], [0, 0, 1, 1], [], []>} : vector<16x32xf32>, vector<32x255xf32>, vector<16x255xf32> -> vector<16x255xf32>
    %179 = tpu.concatenate %171, %178 in 0 : vector<16x255xf32>, vector<16x255xf32> -> vector<32x255xf32>
    %c0_110 = arith.constant 0 : index
    %c0_111 = arith.constant 0 : index
    %180 = vector.load %arg4[%c0_110, %c0_111] : memref<255x128xf32, #tpu.memory_space<vmem>>, vector<255x128xf32>
    %cst_112 = arith.constant dense<0.000000e+00> : vector<32x128xf32>
    %181 = tpu.matmul %179, %180, %cst_112 {dimension_numbers = #tpu.dot_dimension_numbers<[1], [0], [0], [1], [0, 0, 1, 1], [], []>} : vector<32x255xf32>, vector<255x128xf32>, vector<32x128xf32> -> vector<32x128xf32>
    %182 = vector.extract_strided_slice %181 {offsets = [0, 0], sizes = [16, 128], strides = [1, 1]} : vector<32x128xf32> to vector<16x128xf32>
    %c0_113 = arith.constant 0 : index
    %c0_114 = arith.constant 0 : index
    %c0_115 = arith.constant 0 : index
    %183 = vector.load %arg5[%c0_113, %c0_114, %c0_115] : memref<2x16x128xf32, #tpu.memory_space<vmem>>, vector<1x16x128xf32>
    %184 = vector.shape_cast %183 : vector<1x16x128xf32> to vector<16x128xf32>
    %185 = vector.shape_cast %182 : vector<16x128xf32> to vector<1x16x128xf32>
    tpu.vector_store %arg5[%c0_113, %c0_114, %c0_115], %185 {strides = array<i32>} : memref<2x16x128xf32, #tpu.memory_space<vmem>>, vector<1x16x128xf32>,
    %186 = vector.extract_strided_slice %181 {offsets = [16, 0], sizes = [16, 128], strides = [1, 1]} : vector<32x128xf32> to vector<16x128xf32>
    %c1_116 = arith.constant 1 : index
    %c0_117 = arith.constant 0 : index
    %c0_118 = arith.constant 0 : index
    %187 = vector.load %arg5[%c1_116, %c0_117, %c0_118] : memref<2x16x128xf32, #tpu.memory_space<vmem>>, vector<1x16x128xf32>
    %188 = vector.shape_cast %187 : vector<1x16x128xf32> to vector<16x128xf32>
    %189 = vector.shape_cast %186 : vector<16x128xf32> to vector<1x16x128xf32>
    tpu.vector_store %arg5[%c1_116, %c0_117, %c0_118], %189 {strides = array<i32>} : memref<2x16x128xf32, #tpu.memory_space<vmem>>, vector<1x16x128xf32>,
    return
  }
  func.func @transform_0(%arg0: i32) -> (i32, i32, i32) {
    %c0_i32 = arith.constant 0 : i32
    %c0_i32_0 = arith.constant 0 : i32
    %c0_i32_1 = arith.constant 0 : i32
    return %arg0, %c0_i32, %c0_i32_0 : i32, i32, i32
  }
  func.func @transform_1(%arg0: i32) -> (i32, i32, i32) {
    %c0_i32 = arith.constant 0 : i32
    %c0_i32_0 = arith.constant 0 : i32
    %c0_i32_1 = arith.constant 0 : i32
    %c0_i32_2 = arith.constant 0 : i32
    return %c0_i32, %c0_i32_0, %c0_i32_1 : i32, i32, i32
  }
  func.func @transform_2(%arg0: i32) -> (i32, i32) {
    %c0_i32 = arith.constant 0 : i32
    %c0_i32_0 = arith.constant 0 : i32
    %c0_i32_1 = arith.constant 0 : i32
    return %c0_i32, %c0_i32_0 : i32, i32
  }
  func.func @transform_3(%arg0: i32) -> (i32, i32) {
    %c0_i32 = arith.constant 0 : i32
    %c0_i32_0 = arith.constant 0 : i32
    %c0_i32_1 = arith.constant 0 : i32
    return %c0_i32, %c0_i32_0 : i32, i32
  }
  func.func @transform_4(%arg0: i32) -> (i32, i32, i32) {
    %c0_i32 = arith.constant 0 : i32
    %c0_i32_0 = arith.constant 0 : i32
    %c0_i32_1 = arith.constant 0 : i32
    return %arg0, %c0_i32, %c0_i32_0 : i32, i32, i32
  }
}

</mosaic_0001>

<bundles_post_ra>
// kernel: tpu_custom_call.1
= control target key start
LH: loop header
LB: loop body
LE: loop exit
PB: predicated region body
PF: predicated region fallthrough
CT: control target
= control target key end

     0   :  { %9 = vsyncpa [#allocation4], 0  ;;  %s3484_s0 = inlined_call_operand.hbm [shape: f32[4,8,256], index: 0, kind: input, shape index: {}]   ;;  %s3485_s1 = inlined_call_operand.hbm [shape: f32[3,8,24], index: 1, kind: input, shape index: {}]   ;;  %s3486_s2 = inlined_call_operand.hbm [shape: f32[16,32], index: 2, kind: input, shape index: {}]   ;;  %s3487_s3 = inlined_call_operand.hbm [shape: f32[255,128], index: 3, kind: input, shape index: {}]   ;;  %s3488_s4 = inlined_call_operand.hbm [shape: f32[4,16,128], index: 4, kind: output, shape index: {}]  }
   0x1   :  { %11 = vsyncpa [#allocation4 + $0x1], 0 }
   0x2   :  { %12 = vsyncpa [#allocation7], 0 }
   0x3   :  { %13 = vsyncpa [#allocation10], 0 }
   0x4   :  { %14 = vsyncpa [#allocation5], 0 }
   0x5   :  { %16 = vsyncpa [#allocation5 + $0x1], 0  ;;  %s2933_s15 = smov 0   ;;  %s2935_s16 = smov 0  }
   0x6   :  { %s2937_s17 = smov 0   ;;  %s2939_s18 = smov 0  }
   0x7 LB: > { %s2954_s19 = sadd.s32 4294967295, %s2880_s18   ;;  %s2205_s20 = sadd.s32 4294967294, %s2880_s18   ;;  %s2880_s18 = sphi %s2939_s18, %s3513_s18   ;;  %s2876_s17 = sphi %s2937_s17, %s3512_s17   ;;  %s2872_s16 = sphi %s2935_s16, %s3511_s16   ;;  %s2868_s15 = sphi %s2933_s15, %s3510_s15  }
   0x8   : > { %p42_p0 = scmp.ne.s32.totalorder %s2872_s16, %s2868_s15  ;;  %p3489_p1 = scmp.eq.s32.totalorder %s2954_s19, 0 }
   0x9   : > { %p135_p3 = scmp.eq.s32.totalorder %s2205_s20, 1  ;;  %p2206_p5 = scmp.ge.s32.totalorder %s2880_s18, 1 }
   0xa   : > { %p2963_p4 = por %p3489_p1, %p42_p0  ;;  %p142_p7 = scmp.lt.s32.totalorder %s2880_s18, 3 }
   0xb   : > { %p2968_p6 = por %p135_p3, %p42_p0  ;;  %s2882_s24 = smov [#allocation6]  }
   0xc   : > { %s3492_s21 = scalar_select %p2963_p4, 1, 0 }
   0xd   : > { %s3493_s22 = scalar_select %p2968_p6, 1, 0 }
   0xe   : > { %p2973_p8 = pnand %p2206_p5, %p142_p7  ;;  %s154_s25 = sshll.u32 %s2882_s24, 4  ;;  %s2977_s25 = int_to_ptr.vmem [resolvable:$true] %s154_s25 }
   0xf   : > { %s2883_s27 = smov [#allocation8]   ;;  %s2884_s29 = smov [#allocation9]  }
  0x10   : > { %s3494_s23 = scalar_select %p2973_p8, 1, 0 }
  0x11   : > { %p2490_p9 = pneg %p2973_p8  ;;  %s167_s28 = sshll.u32 %s2883_s27, 4  ;;  %s2988_s28 = int_to_ptr.vmem [resolvable:$true] %s167_s28 }
  0x12   : > { %s2990_s30 = sshll.u32 %s2884_s29, 4  ;;  %s2692_s7 = scalar_lea.hbm %s3485_s1, 384  ;;  %s181_s30 = int_to_ptr.vmem [resolvable:$true] %s2990_s30 }
  0x13   : > { %p2984_p11 = pnand %p2490_p9, %p3489_p1  ;;  %p2693_p12 = scmp.ne.s32.totalorder %s3485_s1, %s2692_s7 }
  0x14   : > { %p2699_p5 = scmp.lt.u32.totalorder %s2692_s7, %s3485_s1 }
  0x15   : > { %p3000_p13 = pneg %p2984_p11 }
  0x17   : > { %p2695_p0 = pnand %p3000_p13, %p2693_p12 }
  0x19   : > { %p2696_p3 = pneg %p2695_p0 }
  0x1b   : > { %p2701_p7 = pnand %p2699_p5, %p2696_p3 }
  0x1d   : > { %2704 = shalt.err (!%p2701_p7)
}
  0x1e   : > { %s2705_s13 = scalar_lea.vmem %s2977_s25, 384  ;;  %p2713_p2 = scmp.lt.s32.totalorder %s2977_s25, %s2977_s25 }
  0x1f   : > { %p2706_p9 = scmp.ne.s32.totalorder %s2977_s25, %s2705_s13  ;;  %p2714_p6 = scmp.lt.s32.totalorder %s2705_s13, %s2705_s13 }
  0x21   : > { %p2708_p10 = pnand %p2706_p9, %p3000_p13  ;;  %p2715_p12 = por %p2714_p6, %p2713_p2 }
  0x23   : > { %p2709_p1 = pneg %p2708_p10 }
  0x25   : > { %p2716_p0 = pnand %p2715_p12, %p2709_p1 }
  0x27   : > { %2719 = shalt.err (!%p2716_p0)
}
  0x28   : > { %s2885_s14 = smov 128   ;;  %s2886_s20 = smov 8  }
  0x29   : > { %2493 = dma.hbm_to_vmem [thread:$0]  (!%p2984_p11), %s3485_s1, 384, %s2977_s25, [#allocation7], %s2885_s14, %s2885_s14, %s2886_s20  }
  0x2a   : > { %s2720_s6 = scalar_lea.hbm %s3486_s2, 256 }
  0x2b   : > { %p2721_p1 = scmp.ne.s32.totalorder %s3486_s2, %s2720_s6  ;;  %p2727_p10 = scmp.lt.u32.totalorder %s2720_s6, %s3486_s2 }
  0x2d   : > { %p2723_p2 = pnand %p2721_p1, %p3000_p13 }
  0x2f   : > { %p2724_p6 = pneg %p2723_p2 }
  0x31   : > { %p2729_p3 = pnand %p2727_p10, %p2724_p6 }
  0x33   : > { %2732 = shalt.err (!%p2729_p3)
}
  0x34   : > { %s2733_s25 = scalar_lea.vmem %s2988_s28, 256  ;;  %p2741_p12 = scmp.lt.s32.totalorder %s2988_s28, %s2988_s28 }
  0x35   : > { %p2734_p5 = scmp.ne.s32.totalorder %s2988_s28, %s2733_s25  ;;  %p2742_p0 = scmp.lt.s32.totalorder %s2733_s25, %s2733_s25 }
  0x37   : > { %p2736_p7 = pnand %p2734_p5, %p3000_p13  ;;  %p2743_p1 = por %p2742_p0, %p2741_p12 }
  0x39   : > { %p2737_p9 = pneg %p2736_p7 }
  0x3b   : > { %p2744_p2 = pnand %p2743_p1, %p2737_p9 }
  0x3d   : > { %2747 = shalt.err (!%p2744_p2)
}
  0x3e   : > { %2496 = dma.hbm_to_vmem [thread:$0]  (!%p2984_p11), %s3486_s2, 256, %s2988_s28, [#allocation7], %s2885_s14, %s2885_s14, %s2886_s20  }
  0x3f   : > { %s2748_s29 = scalar_lea.hbm %s3487_s3, 4096 }
  0x40   : > { %p2749_p6 = scmp.ne.s32.totalorder %s3487_s3, %s2748_s29  ;;  %p2755_p5 = scmp.lt.u32.totalorder %s2748_s29, %s3487_s3 }
  0x42   : > { %p2751_p10 = pnand %p2749_p6, %p3000_p13 }
  0x44   : > { %p2752_p3 = pneg %p2751_p10 }
  0x46   : > { %p2757_p7 = pnand %p2755_p5, %p2752_p3 }
  0x48   : > { %2760 = shalt.err (!%p2757_p7)
}
  0x49   : > { %s2761_s9 = scalar_lea.vmem %s181_s30, 4096  ;;  %p2769_p1 = scmp.lt.s32.totalorder %s181_s30, %s181_s30 }
  0x4a   : > { %p2762_p9 = scmp.ne.s32.totalorder %s181_s30, %s2761_s9  ;;  %p2770_p2 = scmp.lt.s32.totalorder %s2761_s9, %s2761_s9 }
  0x4c   : > { %p2764_p12 = pnand %p2762_p9, %p3000_p13  ;;  %p2771_p4 = por %p2770_p2, %p2769_p1 }
  0x4e   : > { %p2765_p0 = pneg %p2764_p12 }
  0x50   : > { %p2772_p8 = pnand %p2771_p4, %p2765_p0 }
  0x52   : > { %2775 = shalt.err (!%p2772_p8)
}
  0x53   : > { %2499 = dma.hbm_to_vmem [thread:$0]  (!%p2984_p11), %s3487_s3, 4096, %s181_s30, [#allocation10], %s2885_s14, %s2885_s14, %s2886_s20  }
  0x54   : > { %s3073_s10 = sadd.s32 1, %s2880_s18   ;;  %s29_s25 = sadd.s32 1, %s2876_s17 }
  0x55   : > { %s26_s26 = ssub.s32 %s2880_s18, %s3073_s10  ;;  %p36_p8 = scmp.ne.s32.totalorder %s2876_s17, %s2872_s16 }
  0x56   : > { %p27_p4 = scmp.eq.s32.totalorder %s26_s26, 0  ;;  %p37_p13 = scmp.eq.s32.totalorder %s2880_s18, 0 }
  0x57   : > { %p2511_p6 = scmp.lt.s32.totalorder %s2880_s18, 2  ;;  %p3497_p3 = scmp.eq.s32.totalorder %s2954_s19, 1 }
  0x58   : > { %s3083_s12 = scalar_select %p27_p4, %s2876_s17, %s29_s25  }
  0x59   : > { %p38_p10 = por %p37_p13, %p36_p8  ;;  %p3087_p5 = por %p3497_p3, %p36_p8 }
  0x5a   : > { %s194_s24 = sand.u32 1, %s2876_s17   ;;  %s2270_s27 = sshll.u32 %s2880_s18, 9 }
  0x5b   : > { %s2211_s30 = sshll.u32 %s194_s24, 5  ;;  %s3096_s29 = scalar_lea.hbm %s3484_s0, %s2270_s27 }
  0x5c   : > { %s198_s5 = scalar_lea.vmem [#allocation3], %s2211_s30  ;;  %p3098_p11 = pnand %p2511_p6, %p38_p10 }
  0x5d   : > { %s206_s6 = sshll.u32 %s198_s5, 4  ;;  %s3104_s8 = scalar_lea.sflag [#allocation4], %s194_s24  ;;  %s3102_s6 = int_to_ptr.vmem [resolvable:$true] %s206_s6 }
  0x5e   : > { %s2776_s9 = scalar_lea.hbm %s3096_s29, 512  ;;  %p2778_p9 = pneg %p3098_p11 }
  0x5f   : > { %p2777_p7 = scmp.ne.s32.totalorder %s3096_s29, %s2776_s9  ;;  %s2781_s26 = scalar_lea.hbm %s3484_s0, 1024 }
  0x60   : > { %p2782_p1 = scmp.lt.u32.totalorder %s3096_s29, %s3484_s0  ;;  %p2783_p2 = scmp.lt.u32.totalorder %s2781_s26, %s2776_s9 }
  0x61   : > { %p2779_p12 = pnand %p2778_p9, %p2777_p7  ;;  %p2785_p8 = scmp.lt.u32.totalorder %s2776_s9, %s3096_s29 }
  0x62   : > { %p2784_p4 = por %p2783_p2, %p2782_p1 }
  0x63   : > { %p2780_p0 = pneg %p2779_p12 }
  0x64   : > { %p2786_p13 = por %p2785_p8, %p2784_p4 }
  0x66   : > { %p2787_p6 = pnand %p2786_p13, %p2780_p0 }
  0x68   : > { %2790 = shalt.err (!%p2787_p6)
}
  0x69   : > { %s2791_s24 = scalar_lea.vmem %s3102_s6, 512  ;;  %s2887_s30 = smov [#allocation3]  }
  0x6a   : > { %p2792_p10 = scmp.ne.s32.totalorder %s3102_s6, %s2791_s24  ;;  %s2796_s14 = sshll.u32 %s2887_s30, 4  ;;  %s2797_s14 = int_to_ptr.vmem [resolvable:$false] %s2796_s14 }
  0x6b   : > { %s2798_s20 = scalar_lea.vmem %s2797_s14, 1024  ;;  %p2799_p12 = scmp.lt.s32.totalorder %s3102_s6, %s2797_s14 }
  0x6c   : > { %p2794_p3 = pnand %p2792_p10, %p2778_p9  ;;  %p2800_p1 = scmp.lt.s32.totalorder %s2798_s20, %s2791_s24 }
  0x6e   : > { %p2795_p7 = pneg %p2794_p3  ;;  %p2801_p2 = por %p2800_p1, %p2799_p12 }
  0x70   : > { %p2802_p4 = pnand %p2801_p2, %p2795_p7 }
  0x72   : > { %2805 = shalt.err (!%p2802_p4)
}
  0x73   : > { %s2888_s5 = smov 256   ;;  %s2889_s9 = smov 16  }
  0x74   : > { %2503 = dma.hbm_to_vmem [thread:$0]  (!%p3098_p11), %s3096_s29, 512, %s3102_s6, %s3104_s8, %s2888_s5, %s2888_s5, %s2889_s9  }
  0x75   : > { %p3500_p9 = scmp.ne.s32.totalorder %s3494_s23, 0 }
  0x76   : > { %s3135_s28 = sand.u32 (!%p3500_p9), 1, %s2872_s16   ;;  %p3501_p0 = scmp.ne.s32.totalorder (!%p3500_p9), %s3492_s21, 0 }
  0x77   : > { %218 = sbr.rel (%p3500_p9) target bundleno = 3003 (0xbbb), region = 36  ;;  %s2216_s11 = sshll.u32 (!%p3500_p9), %s3135_s28, 5 }
  0x78   : > { %s221_s26 = scalar_lea.sflag (!%p3500_p9), [#allocation4], %s3135_s28  ;;  %s224_s25 = scalar_lea.vmem (!%p3500_p9), [#allocation3], %s2216_s11 }
  0x7e   : > { %2851 = dma.done.wait (%p3501_p0), %s221_s26, 512  }
  0x7f   : > { %2853 = vsyncadd (%p3501_p0), %s221_s26, 4294966784  ;;  %p3502_p11 = scmp.eq.s32.totalorder %s2954_s19, 0 }
  0x81   : > { %2855 = dma.done.wait (%p3502_p11), [#allocation7], 640   ;;  %p3503_p8 = pmov %p3502_p11 }
  0x83   : > { %2857 = vsyncadd (%p3503_p8), [#allocation7], 4294966656  ;;  %p3504_p13 = pmov %p3503_p8 }
  0x84   : > { %p3505_p6 = pmov %p3503_p8 }
  0x85   : > { %2859 = dma.done.wait (%p3504_p13), [#allocation10], 4096  }
  0x86   : > { %2861 = vsyncadd (%p3505_p6), [#allocation10], 4294963200  ;;  %v3153_v0 = vld [vmem:[%s224_s25] sm:$0xff]  ;;  %v3155_v1 = vld [vmem:[%s224_s25 + $0x10] sm:$0xff]  ;;  %s2890_s23 = smov 126   ;;  %s2891_s21 = smov 2   ;;  %v520_v42 = vlaneseq }
  0x87   : > { %271 = vrot.lane.b32.xlu0 %v3153_v0, %s2890_s23  ;;  %285 = vrot.lane.b32.xlu1 %v3155_v1, %s2890_s23  ;;  %v3161_v2 = vld [vmem:[%s224_s25 + $0x8] sm:$0xff]  ;;  %v3163_v3 = vld [vmem:[%s224_s25 + $0x18] sm:$0xff]  ;;  %s2892_s29 = smov 1   ;;  %s2893_s6 = smov 127   ;;  %vm274_vm0 = vcmask 1048568   ;;  %vm280_vm1 = vcmask 7168  }
  0x88   : > { %v2572_v4 = vpack.i.bf16 %v3161_v2, %v3153_v0  ;;  %v2894_v7 = vmov 0.0   ;;  %v2577_v19 = vpack.i.bf16 %v3163_v3, %v3155_v1  ;;  %vm337_vm2 = vcmask 1039360   ;;  %v355_v28 = vld [vmem:[#allocation6] sm:$0xff]  ;;  %s2896_s7 = smov 4   ;;  %s2897_s8 = smov 125  }
  0x89   : > { %424 = vmatprep.mubr.f32.mxu1 %v2894_v7  ;;  %2347 = vmatprep.subr.mxu0 %v2894_v7  ;;  %vm356_vm3 = vcmask 195584   ;;  %vm2895_vm4 = vmmov 0   ;;  %v521_v43 = vshrl.u32 %v520_v42, 7  ;;  %v523_v44 = vand.u32 127, %v520_v42  ;;  %s2898_s27 = smov 3   ;;  %s2901_s24 = smov 10  }
  0x8a   : > { %2349 = vmatprep.mubr.msk.f32.mxu0 %vm2895_vm4, %v2894_v7  ;;  %vm534_vm5 = vcmask 1042432   ;;  %vm531_vm11 = vcmask 23552   ;;  %vm612_vm12 = vcmask 1048552   ;;  %vm891_vm13 = vcmask 1022976   ;;  %s2902_s30 = smov 119   ;;  %s2903_s14 = smov 9  }
  0x8b   : > { %277 = vrot.lane.b32.xlu0 %v3161_v2, %s2891_s21  ;;  %290 = vrot.lane.b32.xlu1 %v3163_v3, %s2891_s21  ;;  %v3213_v45 = vadd.s32 %v523_v44, %v521_v43  ;;  %v1074_v46 = vadd.s32 8, %v521_v43  ;;  %s260_s20 = scalar_lea.vmem [#allocation11], %s2216_s11  ;;  %s2272_s9 = sshll.u32 %s2954_s19, 9 }
  0x8c   : > { %s2103_s5 = sshll.u32 %s260_s20, 4  ;;  %s3440_s25 = scalar_lea.hbm %s3488_s4, %s2272_s9  ;;  %s3435_s5 = int_to_ptr.vmem [resolvable:$true] %s2103_s5 }
  0x8d   : > { %vm525_vm6 = vcmp.eq.s32.totalorder %v3213_v45, 2  ;;  %v3216_v47 = vadd.s32 %v1074_v46, %v523_v44  ;;  %vm1076_vm15 = vcmp.eq.s32.totalorder %v3213_v45, 8  ;;  %s2905_s19 = smov [#allocation11]  }
  0x8e   : > { %v2225_v48 = vsel %vm525_vm6, 1.0, %v2894_v7 }
  0x8f   : > { %2573 = vrot.lane.b32.xlu0 %v2572_v4, %s2892_s29  ;;  %2348 = vmatpush3.msk.msra.mxu0 %vm534_vm5, %v2225_v48  ;;  %vm1077_vm14 = vcmp.eq.s32.totalorder %v3216_v47, 8 }
  0x93   : > { %333 = vrot.lane.b32.xlu0 %v3161_v2, %s2893_s6 }
  0x97   : > { %331 = vrot.lane.b32.xlu0 %v3153_v0, %s2893_s6 }
  0xf9   : > { %v272_v5 = vpop.permute.xlu0 %271  ;;  %v286_v6 = vpop.permute.xlu1 %285 }
  0xfa   : > { %275 = vst.msk [vmem:[#allocation2] sm:$0xff] %vm274_vm0, %v272_v5  ;;  %288 = vst.msk [vmem:[#allocation2 + $0x20] sm:$0xff] %vm274_vm0, %v286_v6 }
  0xfd   : > { %v278_v8 = vpop.permute.xlu0 %277  ;;  %v291_v9 = vpop.permute.xlu1 %290 }
  0xfe   : > { %281 = vst.msk [vmem:[#allocation2 + $0x18] sm:$0xff] %vm280_vm1, %v278_v8  ;;  %293 = vst.msk [vmem:[#allocation2 + $0x38] sm:$0xff] %vm280_vm1, %v291_v9 }
 0x101   : > { %v294_v10 = vld [vmem:[#allocation2] sm:$0xff]  ;;  %v2574_v12 = vpop.permute.xlu0 %2573 }
 0x102   : > { %v297_v11 = vld [vmem:[#allocation2 + $0x20] sm:$0xff]  ;;  %303 = vrot.lane.b32.xlu1 %v294_v10, %s2892_s29  ;;  %v2576_v13 = vunpack.i.h.bf16 %v2574_v12  ;;  %v2575_v14 = vunpack.i.l.bf16 %v2574_v12 }
 0x103   : > { %316 = vrot.lane.b32.xlu0 %v297_v11, %s2892_s29 }
 0x104   : > { %v310_v15 = vsel %vm280_vm1, %v2575_v14, %v2576_v13 }
 0x105   : > { %v326_v16 = vld [vmem:[#allocation2 + $0x18] sm:$0xff]  ;;  %v2385_v18 = vpack.c.bf16 %v3161_v2, %v310_v15  ;;  %v334_v20 = vpop.permute.xlu0 %333 }
 0x106   : > { %v329_v17 = vld [vmem:[#allocation2 + $0x38] sm:$0xff]  ;;  %335 = vrot.lane.b32.xlu1 %v326_v16, %s2893_s6 }
 0x107   : > { %349 = vrot.lane.b32.xlu0 %v329_v17, %s2893_s6  ;;  %2386 = vmatprep.subr.bf16.mxu1 %v2385_v18 }
 0x109   : > { %v332_v22 = vpop.permute.xlu0 %331 }
 0x10a   : > { %2578 = vrot.lane.b32.xlu1 %v2577_v19, %s2892_s29  ;;  %v338_v29 = vsel %vm337_vm2, %v332_v22, %v334_v20 }
 0x10e   : > { %347 = vrot.lane.b32.xlu1 %v3163_v3, %s2893_s6 }
 0x112   : > { %345 = vrot.lane.b32.xlu1 %v3155_v1, %s2893_s6 }
 0x174   : > { %v304_v21 = vpop.permute.xlu1 %303 }
 0x175   : > { %v309_v23 = vsel %vm280_vm1, %v304_v21, %v2575_v14  ;;  %v317_v26 = vpop.permute.xlu0 %316 }
 0x176   : > { %v2387_v24 = vpack.c.bf16 %v3153_v0, %v309_v23 }
 0x178   : > { %v336_v25 = vpop.permute.xlu1 %335  ;;  %2388 = vmatpush1.bf16.msra.mxu1 %v2387_v24 }
 0x179   : > { %v339_v27 = vsel %vm337_vm2, %v334_v20, %v336_v25  ;;  %v350_v33 = vpop.permute.xlu0 %349 }
 0x17a   : > { %364 = vmatprep.subr.mxu1 %v339_v27 }
 0x17c   : > { %v2579_v30 = vpop.permute.xlu1 %2578  ;;  %365 = vmatpush1.msra.mxu1 %v338_v29 }
 0x17d   : > { %v2581_v31 = vunpack.i.h.bf16 %v2579_v30  ;;  %v2580_v32 = vunpack.i.l.bf16 %v2579_v30  ;;  %2223 = vmatmul.mubr.msk.f32.vlgmr.msra.gmra.mrb[0].mxu1 %vm356_vm3, %v355_v28 }
 0x17e   : > { %495 = vmatprep.mubr.f32.mxu1 %v2894_v7 }
 0x17f   : > { %v322_v34 = vsel %vm280_vm1, %v317_v26, %v2580_v32  ;;  %v323_v35 = vsel %vm280_vm1, %v2580_v32, %v2581_v31 }
 0x180   : > { %v2391_v36 = vpack.c.bf16 %v3155_v1, %v322_v34  ;;  %v348_v37 = vpop.permute.xlu1 %347  ;;  %v2389_v38 = vpack.c.bf16 %v3163_v3, %v323_v35  ;;  %v910_v34 = vld [vmem:[#allocation6 + $0x8] sm:$0xff] }
 0x181   : > { %v352_v39 = vsel %vm337_vm2, %v348_v37, %v350_v33 }
 0x182   : > { %2390 = vmatprep.subr.bf16.mxu1 %v2389_v38 }
 0x183   : > { %2392 = vmatpush1.bf16.msra.mxu1 %v2391_v36 }
 0x184   : > { %v346_v40 = vpop.permute.xlu1 %345  ;;  %435 = vmatprep.subr.mxu1 %v352_v39 }
 0x185   : > { %v351_v41 = vsel %vm337_vm2, %v346_v40, %v348_v37 }
 0x187   : > { %436 = vmatpush1.msra.mxu1 %v351_v41 }
 0x188   : > { %2224 = vmatmul.mubr.msk.f32.vlgmr.msra.gmra.mrb[2].mxu1 %vm356_vm3, %v355_v28  ;;  %2337 = vmatprep.subr.mxu1 %v2894_v7 }
 0x189   : > { %2339 = vmatprep.mubr.msk.f32.mxu1 %vm2895_vm4, %v2894_v7  ;;  %2338 = vmatpush3.msk.msra.mxu1 %vm534_vm5, %v2225_v48 }
 0x18a   : > { %2342 = vmatprep.subr.mxu1 %v2894_v7 }
 0x250   : > { %v426_v49 = vpop.f32.mrb[0].mxu1 }
 0x251   : > { %vm502_vm7 = vcmp.gt.f32.partialorder %v426_v49, 0.0  ;;  %v506_v50 = vmul.f32 0.01, %v426_v49  ;;  %v428_v51 = vpop.f32.mrb[1].mxu1 }
 0x252   : > { %vm503_vm8 = vcmp.gt.f32.partialorder %v428_v51, 0.0  ;;  %v507_v52 = vmul.f32 0.01, %v428_v51 }
 0x253   : > { %v510_v53 = vsel %vm502_vm7, %v426_v49, %v506_v50 }
 0x254   : > { %v3223_v54 = vadd.f32 %v510_v53, %v3153_v0  ;;  %v511_v55 = vsel %vm503_vm8, %v428_v51, %v507_v52  ;;  %v2237_v51 = vsel %vm1077_vm14, 1.0, %v2894_v7  ;;  %v2899_v52 = vmov 0.0|0.0  }
 0x255   : > { %v3228_v56 = vadd.f32 %v511_v55, %v3161_v2  ;;  %v2900_v55 = vmov 1.0  }
 0x256   : > { %529 = vrot.lane.b32.xlu0 %v3223_v54, %s2893_s6 }
 0x257   : > { %v2582_v8 = vpack.i.bf16 %v3228_v56, %v3223_v54 }
 0x25a   : > { %615 = vrot.lane.b32.xlu0 %v3228_v56, %s2896_s7 }
 0x25b   : > { %v497_v57 = vpop.f32.mrb[2].mxu1 }
 0x25c   : > { %vm504_vm9 = vcmp.gt.f32.partialorder %v497_v57, 0.0  ;;  %v508_v58 = vmul.f32 0.01, %v497_v57  ;;  %v499_v59 = vpop.f32.mrb[3].mxu1 }
 0x25d   : > { %vm505_vm10 = vcmp.gt.f32.partialorder %v499_v59, 0.0  ;;  %v509_v60 = vmul.f32 0.01, %v499_v59 }
 0x25e   : > { %v512_v61 = vsel %vm504_vm9, %v497_v57, %v508_v58  ;;  %v2402_v57 = vpack.c.bf16 %v2237_v51, %v2900_v55 }
 0x25f   : > { %v3232_v62 = vadd.f32 %v3155_v1, %v512_v61  ;;  %v513_v63 = vsel %vm505_vm10, %v499_v59, %v509_v60 }
 0x260   : > { %v3237_v0 = vadd.f32 %v3163_v3, %v513_v63 }
 0x261   : > { %693 = vrot.lane.b32.xlu1 %v3232_v62, %s2893_s6 }
 0x262   : > { %v2587_v24 = vpack.i.bf16 %v3237_v0, %v3232_v62 }
 0x265   : > { %773 = vrot.lane.b32.xlu1 %v3237_v0, %s2896_s7 }
 0x2c8   : > { %v530_v2 = vpop.permute.xlu0 %529 }
 0x2c9   : > { %2340 = vmatmul.mubr.msk.f32.vlgmr.msra.gmra.mrb[4].mxu1 %vm531_vm11, %v530_v2 }
 0x2ca   : > { %2343 = vmatpush3.msk.msra.mxu1 %vm534_vm5, %v2225_v48  ;;  %2344 = vmatprep.mubr.msk.f32.mxu1 %vm2895_vm4, %v2894_v7 }
 0x2cb   : > { %2352 = vmatprep.subr.mxu1 %v2894_v7 }
 0x2cc   : > { %v616_v1 = vpop.permute.xlu0 %615 }
 0x2cd   : > { %2345 = vmatmul.mubr.msk.f32.vlgmr.msra.gmra.mrb[6].mxu1 %vm531_vm11, %v616_v1 }
 0x2ce   : > { %2353 = vmatpush3.msk.msra.mxu1 %vm534_vm5, %v2225_v48  ;;  %2354 = vmatprep.mubr.msk.f32.mxu1 %vm2895_vm4, %v2894_v7  ;;  %vm1088_vm5 = vcmask 1040384  }
 0x2cf   : > { %vm3292_vm6 = vmpackc.low %vm1088_vm5, %vm1076_vm15 }
 0x2d3   : > { %v694_v3 = vpop.permute.xlu1 %693 }
 0x2d4   : > { %2350 = vmatmul.mubr.msk.f32.vlgmr.msra.gmra.mrb[0].mxu0 %vm531_vm11, %v694_v3 }
 0x2d5   : > { %978 = vmatprep.mubr.f32.mxu0 %v2894_v7 }
 0x2d7   : > { %v774_v4 = vpop.permute.xlu1 %773 }
 0x2d8   : > { %2355 = vmatmul.mubr.msk.f32.vlgmr.msra.gmra.mrb[8].mxu1 %vm531_vm11, %v774_v4 }
 0x2d9   : > { %1049 = vmatprep.mubr.f32.mxu1 %v2894_v7 }
 0x39c   : > { %v604_v5 = vpop.f32.mrb[4].mxu1 }
 0x39d   : > { %609 = vrot.lane.b32.xlu0 %v604_v5, %s2897_s8  ;;  %v2341_v6 = vpop.f32.mrb[5].mxu1 }
 0x3a0   : > { %v685_v9 = vpop.f32.mrb[6].mxu1 }
 0x3a1   : > { %689 = vst.msk [vmem:[#allocation2 + $0x18] sm:$0xff] %vm531_vm11, %v685_v9  ;;  %2583 = vrot.lane.b32.xlu0 %v2582_v8, %s2898_s27  ;;  %v2346_v10 = vpop.f32.mrb[7].mxu1 }
 0x3a5   : > { %887 = vrot.lane.b32.xlu0 %v3228_v56, %s2897_s8 }
 0x3a7   : > { %v763_v11 = vpop.f32.mrb[0].mxu0 }
 0x3a8   : > { %v2351_v12 = vpop.f32.mrb[1].mxu0  ;;  %768 = vrot.lane.b32.xlu1 %v763_v11, %s2897_s8  ;;  %v880_v23 = vld [vmem:[#allocation2 + $0x18] sm:$0xff] }
 0x3a9   : > { %885 = vrot.lane.b32.xlu0 %v3223_v54, %s2897_s8 }
 0x3ab   : > { %v843_v13 = vpop.f32.mrb[8].mxu1 }
 0x3ac   : > { %847 = vst.msk [vmem:[#allocation2 + $0x38] sm:$0xff] %vm531_vm11, %v843_v13  ;;  %v2356_v14 = vpop.f32.mrb[9].mxu1 }
 0x3b3   : > { %v883_v26 = vld [vmem:[#allocation2 + $0x38] sm:$0xff] }
 0x40f   : > { %v610_v15 = vpop.permute.xlu0 %609 }
 0x410   : > { %613 = vst.msk [vmem:[#allocation2] sm:$0xff] %vm612_vm12, %v610_v15 }
 0x413   : > { %v2584_v16 = vpop.permute.xlu0 %2583 }
 0x414   : > { %v2586_v17 = vunpack.i.h.bf16 %v2584_v16  ;;  %v2585_v18 = vunpack.i.l.bf16 %v2584_v16 }
 0x416   : > { %v864_v19 = vsel %vm531_vm11, %v2585_v18, %v2586_v17 }
 0x417   : > { %v848_v20 = vld [vmem:[#allocation2] sm:$0xff]  ;;  %v2393_v21 = vpack.c.bf16 %v3228_v56, %v864_v19  ;;  %v888_v27 = vpop.permute.xlu0 %887 }
 0x418   : > { %857 = vrot.lane.b32.xlu1 %v848_v20, %s2898_s27 }
 0x419   : > { %2394 = vmatprep.subr.bf16.mxu0 %v2393_v21 }
 0x41a   : > { %v769_v22 = vpop.permute.xlu1 %768 }
 0x41b   : > { %771 = vst.msk [vmem:[#allocation2 + $0x20] sm:$0xff] %vm612_vm12, %v769_v22  ;;  %v886_v31 = vpop.permute.xlu0 %885  ;;  %vm1445_vm12 = vcmask 973824  }
 0x41c   : > { %889 = vrot.lane.b32.xlu1 %v880_v23, %s2897_s8  ;;  %v892_v35 = vsel %vm891_vm13, %v886_v31, %v888_v27 }
 0x420   : > { %2588 = vrot.lane.b32.xlu1 %v2587_v24, %s2898_s27 }
 0x422   : > { %v851_v25 = vld [vmem:[#allocation2 + $0x20] sm:$0xff] }
 0x423   : > { %870 = vrot.lane.b32.xlu0 %v851_v25, %s2898_s27 }
 0x424   : > { %901 = vrot.lane.b32.xlu1 %v3237_v0, %s2897_s8 }
 0x427   : > { %903 = vrot.lane.b32.xlu0 %v883_v26, %s2897_s8 }
 0x428   : > { %899 = vrot.lane.b32.xlu1 %v3232_v62, %s2897_s8 }
 0x48a   : > { %v858_v28 = vpop.permute.xlu1 %857 }
 0x48b   : > { %v863_v29 = vsel %vm531_vm11, %v858_v28, %v2585_v18 }
 0x48c   : > { %v2395_v30 = vpack.c.bf16 %v3223_v54, %v863_v29 }
 0x48e   : > { %2396 = vmatpush1.bf16.msra.mxu0 %v2395_v30  ;;  %v890_v32 = vpop.permute.xlu1 %889 }
 0x48f   : > { %v893_v33 = vsel %vm891_vm13, %v888_v27, %v890_v32 }
 0x490   : > { %918 = vmatprep.subr.mxu0 %v893_v33 }
 0x492   : > { %919 = vmatpush1.msra.mxu0 %v892_v35  ;;  %v2589_v36 = vpop.permute.xlu1 %2588 }
 0x493   : > { %v2591_v37 = vunpack.i.h.bf16 %v2589_v36  ;;  %v2590_v38 = vunpack.i.l.bf16 %v2589_v36  ;;  %2234 = vmatmul.mubr.msk.f32.vlgmr.msra.gmra.mrb[2].mxu0 %vm356_vm3, %v910_v34  ;;  %2401 = vmatprep.subr.bf16.mxu0 %v2899_v52 }
 0x494   : > { %2361 = vmatprep.mubr.msk.f32.mxu0 %vm2895_vm4, %v2894_v7  ;;  %2404 = vmatpush3.bf16.msk.msra.mxu0 %vm3292_vm6, %v2402_v57 }
 0x495   : > { %v871_v39 = vpop.permute.xlu0 %870  ;;  %v877_v40 = vsel %vm531_vm11, %v2590_v38, %v2591_v37  ;;  %2409 = vmatprep.subr.bf16.mxu0 %v2899_v52 }
 0x496   : > { %v876_v41 = vsel %vm531_vm11, %v871_v39, %v2590_v38  ;;  %v902_v42 = vpop.permute.xlu1 %901  ;;  %v2397_v43 = vpack.c.bf16 %v3237_v0, %v877_v40  ;;  %vm1085_vm11 = vcmask 72704   ;;  %v1464_v39 = vld [vmem:[#allocation6 + $0x10] sm:$0xff] }
 0x497   : > { %v2399_v44 = vpack.c.bf16 %v3232_v62, %v876_v41 }
 0x498   : > { %2398 = vmatprep.subr.bf16.mxu1 %v2397_v43 }
 0x499   : > { %v904_v46 = vpop.permute.xlu0 %903  ;;  %2400 = vmatpush1.bf16.msra.mxu1 %v2399_v44 }
 0x49a   : > { %v900_v48 = vpop.permute.xlu1 %899  ;;  %v906_v49 = vsel %vm891_vm13, %v902_v42, %v904_v46 }
 0x49b   : > { %v905_v50 = vsel %vm891_vm13, %v900_v48, %v902_v42  ;;  %989 = vmatprep.subr.mxu1 %v906_v49 }
 0x49d   : > { %990 = vmatpush1.msra.mxu1 %v905_v50 }
 0x49e   : > { %2235 = vmatmul.mubr.msk.f32.vlgmr.msra.gmra.mrb[10].mxu1 %vm356_vm3, %v910_v34  ;;  %2405 = vmatprep.subr.bf16.mxu1 %v2899_v52 }
 0x49f   : > { %2368 = vmatprep.mubr.msk.f32.mxu1 %vm2895_vm4, %v2894_v7  ;;  %2408 = vmatpush3.bf16.msk.msra.mxu1 %vm3292_vm6, %v2402_v57 }
 0x4a0   : > { %2413 = vmatprep.subr.bf16.mxu1 %v2899_v52 }
 0x566   : > { %v980_v45 = vpop.f32.mrb[2].mxu0 }
 0x567   : > { %vm1056_vm7 = vcmp.gt.f32.partialorder %v980_v45, 0.0  ;;  %v1060_v47 = vmul.f32 0.01, %v980_v45  ;;  %v982_v58 = vpop.f32.mrb[3].mxu0 }
 0x568   : > { %vm1057_vm8 = vcmp.gt.f32.partialorder %v982_v58, 0.0  ;;  %v1061_v59 = vmul.f32 0.01, %v982_v58 }
 0x569   : > { %v1064_v60 = vsel %vm1056_vm7, %v980_v45, %v1060_v47 }
 0x56a   : > { %v3301_v61 = vadd.f32 %v1064_v60, %v3223_v54  ;;  %v1065_v63 = vsel %vm1057_vm8, %v982_v58, %v1061_v59  ;;  %vm1719_vm8 = vcmask 261120  }
 0x56b   : > { %v3306_v2 = vadd.f32 %v1065_v63, %v3228_v56 }
 0x56c   : > { %1083 = vrot.lane.b32.xlu0 %v3301_v61, %s2893_s6 }
 0x56d   : > { %v2592_v13 = vpack.i.bf16 %v3306_v2, %v3301_v61 }
 0x570   : > { %1169 = vrot.lane.b32.xlu0 %v3306_v2, %s2901_s24 }
 0x571   : > { %v1051_v1 = vpop.f32.mrb[10].mxu1 }
 0x572   : > { %vm1058_vm9 = vcmp.gt.f32.partialorder %v1051_v1, 0.0  ;;  %v1062_v3 = vmul.f32 0.01, %v1051_v1  ;;  %v1053_v4 = vpop.f32.mrb[11].mxu1 }
 0x573   : > { %vm1059_vm10 = vcmp.gt.f32.partialorder %v1053_v4, 0.0  ;;  %v1063_v5 = vmul.f32 0.01, %v1053_v4 }
 0x574   : > { %v1066_v6 = vsel %vm1058_vm9, %v1051_v1, %v1062_v3 }
 0x575   : > { %v3310_v54 = vadd.f32 %v1066_v6, %v3232_v62  ;;  %v1067_v8 = vsel %vm1059_vm10, %v1053_v4, %v1063_v5 }
 0x576   : > { %v3315_v56 = vadd.f32 %v1067_v8, %v3237_v0 }
 0x577   : > { %1247 = vrot.lane.b32.xlu1 %v3310_v54, %s2893_s6 }
 0x578   : > { %v2597_v29 = vpack.i.bf16 %v3315_v56, %v3310_v54 }
 0x57b   : > { %1327 = vrot.lane.b32.xlu1 %v3315_v56, %s2901_s24 }
 0x5de   : > { %v1084_v9 = vpop.permute.xlu0 %1083 }
 0x5df   : > { %2362 = vmatmul.mubr.msk.f32.vlgmr.msra.gmra.mrb[4].mxu0 %vm1085_vm11, %v1084_v9 }
 0x5e0   : > { %2412 = vmatpush3.bf16.msk.msra.mxu0 %vm3292_vm6, %v2402_v57  ;;  %2375 = vmatprep.mubr.msk.f32.mxu0 %vm2895_vm4, %v2894_v7 }
 0x5e2   : > { %v1170_v62 = vpop.permute.xlu0 %1169 }
 0x5e3   : > { %2369 = vmatmul.mubr.msk.f32.vlgmr.msra.gmra.mrb[12].mxu1 %vm1085_vm11, %v1170_v62 }
 0x5e4   : > { %2416 = vmatpush3.bf16.msk.msra.mxu1 %vm3292_vm6, %v2402_v57  ;;  %2382 = vmatprep.mubr.msk.f32.mxu1 %vm2895_vm4, %v2894_v7  ;;  %vm1166_vm4 = vcmask 1048504   ;;  %vm2904_vm6 = vmmov 1  }
 0x5e9   : > { %v1248_v0 = vpop.permute.xlu1 %1247 }
 0x5ea   : > { %2376 = vmatmul.mubr.msk.f32.vlgmr.msra.gmra.mrb[6].mxu0 %vm1085_vm11, %v1248_v0 }
 0x5eb   : > { %1532 = vmatprep.mubr.f32.mxu0 %v2894_v7 }
 0x5ed   : > { %v1328_v10 = vpop.permute.xlu1 %1327 }
 0x5ee   : > { %2383 = vmatmul.mubr.msk.f32.vlgmr.msra.gmra.mrb[14].mxu1 %vm1085_vm11, %v1328_v10 }
 0x5ef   : > { %1603 = vmatprep.mubr.f32.mxu1 %v2894_v7 }
 0x6b2   : > { %v1158_v11 = vpop.f32.mrb[4].mxu0 }
 0x6b3   : > { %v2363_v12 = vpop.f32.mrb[5].mxu0  ;;  %1163 = vrot.lane.b32.xlu0 %v1158_v11, %s2902_s30 }
 0x6b6   : > { %v1239_v14 = vpop.f32.mrb[12].mxu1 }
 0x6b7   : > { %1243 = vst.msk [vmem:[#allocation2 + $0x18] sm:$0xff] %vm1085_vm11, %v1239_v14  ;;  %2593 = vrot.lane.b32.xlu0 %v2592_v13, %s2903_s14  ;;  %v2370_v15 = vpop.f32.mrb[13].mxu1 }
 0x6bb   : > { %1441 = vrot.lane.b32.xlu0 %v3306_v2, %s2902_s30 }
 0x6bd   : > { %v1317_v16 = vpop.f32.mrb[6].mxu0 }
 0x6be   : > { %v2377_v17 = vpop.f32.mrb[7].mxu0  ;;  %1322 = vrot.lane.b32.xlu1 %v1317_v16, %s2902_s30  ;;  %v1434_v28 = vld [vmem:[#allocation2 + $0x18] sm:$0xff] }
 0x6bf   : > { %1439 = vrot.lane.b32.xlu0 %v3301_v61, %s2902_s30 }
 0x6c1   : > { %v1397_v18 = vpop.f32.mrb[14].mxu1 }
 0x6c2   : > { %1401 = vst.msk [vmem:[#allocation2 + $0x38] sm:$0xff] %vm1085_vm11, %v1397_v18  ;;  %v2384_v19 = vpop.f32.mrb[15].mxu1 }
 0x6c9   : > { %v1437_v31 = vld [vmem:[#allocation2 + $0x38] sm:$0xff] }
 0x725   : > { %v1164_v20 = vpop.permute.xlu0 %1163 }
 0x726   : > { %1167 = vst.msk [vmem:[#allocation2] sm:$0xff] %vm1166_vm4, %v1164_v20 }
 0x729   : > { %v2594_v21 = vpop.permute.xlu0 %2593 }
 0x72a   : > { %v2596_v22 = vunpack.i.h.bf16 %v2594_v21  ;;  %v2595_v23 = vunpack.i.l.bf16 %v2594_v21 }
 0x72c   : > { %v1418_v24 = vsel %vm1085_vm11, %v2595_v23, %v2596_v22 }
 0x72d   : > { %v1402_v25 = vld [vmem:[#allocation2] sm:$0xff]  ;;  %v2417_v26 = vpack.c.bf16 %v3306_v2, %v1418_v24  ;;  %v1442_v32 = vpop.permute.xlu0 %1441 }
 0x72e   : > { %1411 = vrot.lane.b32.xlu1 %v1402_v25, %s2903_s14 }
 0x72f   : > { %2418 = vmatprep.subr.bf16.mxu0 %v2417_v26 }
 0x730   : > { %v1323_v27 = vpop.permute.xlu1 %1322 }
 0x731   : > { %1325 = vst.msk [vmem:[#allocation2 + $0x20] sm:$0xff] %vm1166_vm4, %v1323_v27  ;;  %v1440_v36 = vpop.permute.xlu0 %1439 }
 0x732   : > { %1443 = vrot.lane.b32.xlu1 %v1434_v28, %s2902_s30  ;;  %v1446_v40 = vsel %vm1445_vm12, %v1440_v36, %v1442_v32 }
 0x736   : > { %2598 = vrot.lane.b32.xlu1 %v2597_v29, %s2903_s14 }
 0x738   : > { %v1405_v30 = vld [vmem:[#allocation2 + $0x20] sm:$0xff] }
 0x739   : > { %1424 = vrot.lane.b32.xlu0 %v1405_v30, %s2903_s14 }
 0x73a   : > { %1455 = vrot.lane.b32.xlu1 %v3315_v56, %s2902_s30 }
 0x73d   : > { %1457 = vrot.lane.b32.xlu0 %v1437_v31, %s2902_s30 }
 0x73e   : > { %1453 = vrot.lane.b32.xlu1 %v3310_v54, %s2902_s30 }
 0x7a0   : > { %v1412_v33 = vpop.permute.xlu1 %1411 }
 0x7a1   : > { %v1417_v34 = vsel %vm1085_vm11, %v1412_v33, %v2595_v23 }
 0x7a2   : > { %v2419_v35 = vpack.c.bf16 %v3301_v61, %v1417_v34 }
 0x7a4   : > { %2420 = vmatpush1.bf16.msra.mxu0 %v2419_v35  ;;  %v1444_v37 = vpop.permute.xlu1 %1443 }
 0x7a5   : > { %v1447_v38 = vsel %vm1445_vm12, %v1442_v32, %v1444_v37 }
 0x7a6   : > { %1472 = vmatprep.subr.mxu0 %v1447_v38 }
 0x7a8   : > { %1473 = vmatpush1.msra.mxu0 %v1446_v40  ;;  %v2599_v41 = vpop.permute.xlu1 %2598 }
 0x7a9   : > { %v2601_v42 = vunpack.i.h.bf16 %v2599_v41  ;;  %v2600_v43 = vunpack.i.l.bf16 %v2599_v41  ;;  %2250 = vmatmul.mubr.msk.f32.vlgmr.msra.gmra.mrb[8].mxu0 %vm356_vm3, %v1464_v39 }
 0x7ab   : > { %v1425_v44 = vpop.permute.xlu0 %1424  ;;  %v1431_v46 = vsel %vm1085_vm11, %v2600_v43, %v2601_v42 }
 0x7ac   : > { %v1430_v48 = vsel %vm1085_vm11, %v1425_v44, %v2600_v43  ;;  %v1456_v49 = vpop.permute.xlu1 %1455  ;;  %v2421_v50 = vpack.c.bf16 %v3315_v56, %v1431_v46 }
 0x7ad   : > { %v2423_v51 = vpack.c.bf16 %v3310_v54, %v1430_v48 }
 0x7ae   : > { %2422 = vmatprep.subr.bf16.mxu1 %v2421_v50 }
 0x7af   : > { %v1458_v52 = vpop.permute.xlu0 %1457  ;;  %2424 = vmatpush1.bf16.msra.mxu1 %v2423_v51 }
 0x7b0   : > { %v1454_v53 = vpop.permute.xlu1 %1453  ;;  %v1460_v55 = vsel %vm1445_vm12, %v1456_v49, %v1458_v52 }
 0x7b1   : > { %v1459_v57 = vsel %vm1445_vm12, %v1454_v53, %v1456_v49  ;;  %1543 = vmatprep.subr.mxu1 %v1460_v55 }
 0x7b3   : > { %1544 = vmatpush1.msra.mxu1 %v1459_v57 }
 0x7b4   : > { %2251 = vmatmul.mubr.msk.f32.vlgmr.msra.gmra.mrb[16].mxu1 %vm356_vm3, %v1464_v39 }
 0x7b5   : > { %1790 = vmatprep.mubr.f32.mxu1 %v2894_v7 }
 0x87c   : > { %v1534_v45 = vpop.f32.mrb[8].mxu0 }
 0x87d   : > { %vm1610_vm14 = vcmp.gt.f32.partialorder %v1534_v45, 0.0  ;;  %v1614_v47 = vmul.f32 0.01, %v1534_v45  ;;  %v1536_v58 = vpop.f32.mrb[9].mxu0 }
 0x87e   : > { %vm1611_vm15 = vcmp.gt.f32.partialorder %v1536_v58, 0.0  ;;  %v1615_v59 = vmul.f32 0.01, %v1536_v58 }
 0x87f   : > { %v1618_v60 = vsel %vm1610_vm14, %v1534_v45, %v1614_v47 }
 0x880   : > { %v1619_v63 = vsel %vm1611_vm15, %v1536_v58, %v1615_v59  ;;  %v1622_v1 = vadd.f32 %v1618_v60, %v3301_v61 }
 0x881   : > { %v1623_v3 = vadd.f32 %v1619_v63, %v3306_v2 }
 0x883   : > { %1634 = vrot.lane.b32.xlu0 %v1623_v3, %s2891_s21  ;;  %v2612_v4 = vpack.i.bf16 %v1623_v3, %v1622_v1  ;;  %v1966_v3 = vld [vmem:[#allocation9 + $0x80] sm:$0xff] }
 0x887   : > { %1629 = vrot.lane.b32.xlu0 %v1622_v1, %s2890_s23  ;;  %v1605_v5 = vpop.f32.mrb[16].mxu1 }
 0x888   : > { %vm1612_vm3 = vcmp.gt.f32.partialorder %v1605_v5, 0.0  ;;  %v1616_v6 = vmul.f32 0.01, %v1605_v5  ;;  %v1607_v8 = vpop.f32.mrb[17].mxu1 }
 0x889   : > { %vm1613_vm5 = vcmp.gt.f32.partialorder %v1607_v8, 0.0  ;;  %v1617_v9 = vmul.f32 0.01, %v1607_v8 }
 0x88a   : > { %v1620_v62 = vsel %vm1612_vm3, %v1605_v5, %v1616_v6  ;;  %v1950_v5 = vld [vmem:[#allocation9] sm:$0xff] }
 0x88b   : > { %v1621_v0 = vsel %vm1613_vm5, %v1607_v8, %v1617_v9  ;;  %v1624_v10 = vadd.f32 %v1620_v62, %v3310_v54  ;;  %v1951_v62 = vld [vmem:[#allocation9 + $0x8] sm:$0xff] }
 0x88c   : > { %v1625_v11 = vadd.f32 %v1621_v0, %v3315_v56  ;;  %v1968_v0 = vld [vmem:[#allocation9 + $0x90] sm:$0xff] }
 0x88d   : > { %1641 = vrot.lane.b32.xlu0 %v1624_v10, %s2890_s23 }
 0x88e   : > { %1646 = vrot.lane.b32.xlu1 %v1625_v11, %s2891_s21  ;;  %v2617_v61 = vpack.i.bf16 %v1625_v11, %v1624_v10  ;;  %v1969_v10 = vld [vmem:[#allocation9 + $0x98] sm:$0xff]  ;;  %s2806_s21 = scalar_lea.vmem %s3435_s5, 512 }
 0x88f   : > { %p2807_p10 = scmp.ne.s32.totalorder %s3435_s5, %s2806_s21 }
 0x891   : > { %2613 = vrot.lane.b32.xlu0 %v2612_v4, %s2897_s8  ;;  %p2808_p3 = pnand %p2807_p10, %p3087_p5 }
 0x892   : > { %2603 = vrot.lane.b32.xlu1 %v2612_v4, %s2893_s6 }
 0x893   : > { %p2809_p7 = pneg %p2808_p3 }
 0x895   : > { %2618 = vrot.lane.b32.xlu0 %v2617_v61, %s2893_s6 }
 0x896   : > { %2608 = vrot.lane.b32.xlu1 %v2612_v4, %s2890_s23 }
 0x899   : > { %2628 = vrot.lane.b32.xlu0 %v2617_v61, %s2897_s8 }
 0x89d   : > { %2633 = vrot.lane.b32.xlu0 %v2612_v4, %s2892_s29  ;;  %v1967_v4 = vld [vmem:[#allocation9 + $0x88] sm:$0xff] }
 0x89e   : > { %v2441_v11 = vpack.c.bf16 %v1967_v4, %v1966_v3 }
 0x8a0   : > { %2442 = vmatprep.subr.bf16.mxu0 %v2441_v11 }
 0x8f5   : > { %v1635_v2 = vpop.permute.xlu0 %1634 }
 0x8f6   : > { %1637 = vst.msk [vmem:[#allocation2 + $0x18] sm:$0xff] %vm280_vm1, %v1635_v2  ;;  %v2445_v2 = vpack.c.bf16 %v1969_v10, %v1968_v0 }
 0x8f9   : > { %v1630_v54 = vpop.permute.xlu0 %1629 }
 0x8fa   : > { %1632 = vst.msk [vmem:[#allocation2] sm:$0xff] %vm274_vm0, %v1630_v54  ;;  %v1952_v54 = vld [vmem:[#allocation9 + $0x10] sm:$0xff] }
 0x8fd   : > { %v1653_v56 = vld [vmem:[#allocation2 + $0x18] sm:$0xff] }
 0x8fe   : > { %1672 = vrot.lane.b32.xlu1 %v1653_v56, %s2897_s8  ;;  %v1953_v56 = vld [vmem:[#allocation9 + $0x18] sm:$0xff] }
 0x8ff   : > { %v1642_v12 = vpop.permute.xlu0 %1641 }
 0x900   : > { %1644 = vst.msk [vmem:[#allocation2 + $0x20] sm:$0xff] %vm274_vm0, %v1642_v12  ;;  %v1647_v13 = vpop.permute.xlu1 %1646  ;;  %vm1665_vm0 = vcmask 1031168  }
 0x901   : > { %1649 = vst.msk [vmem:[#allocation2 + $0x38] sm:$0xff] %vm280_vm1, %v1647_v13  ;;  %v1650_v20 = vld [vmem:[#allocation2] sm:$0xff] }
 0x902   : > { %2623 = vrot.lane.b32.xlu1 %v2617_v61, %s2890_s23  ;;  %s2089_s23 = scalar_lea.sflag [#allocation5], %s3135_s28 }
 0x903   : > { %v2614_v14 = vpop.permute.xlu0 %2613 }
 0x904   : > { %v2616_v15 = vunpack.i.h.bf16 %v2614_v14  ;;  %v2615_v16 = vunpack.i.l.bf16 %v2614_v14  ;;  %v2604_v17 = vpop.permute.xlu1 %2603 }
 0x905   : > { %v2606_v18 = vunpack.i.h.bf16 %v2604_v17  ;;  %v2605_v19 = vunpack.i.l.bf16 %v2604_v17  ;;  %v1971_v17 = vld [vmem:[#allocation9 + $0xa8] sm:$0xff] }
 0x906   : > { %v1674_v21 = vsel %vm891_vm13, %v2615_v16, %v2616_v15 }
 0x907   : > { %v2642_v22 = vpack.i.bf16 %v2605_v19, %v1650_v20  ;;  %v1660_v23 = vsel %vm337_vm2, %v2605_v19, %v2606_v18  ;;  %v2619_v30 = vpop.permute.xlu0 %2618  ;;  %v1803_v42 = vld [vmem:[#allocation2 + $0x20] sm:$0xff]  ;;  %v2447_v20 = vpack.c.bf16 %v1953_v56, %v1952_v54 }
 0x908   : > { %v2609_v24 = vpop.permute.xlu1 %2608  ;;  %v1808_v25 = vld [vmem:[#allocation2 + $0x38] sm:$0xff]  ;;  %v2637_v28 = vpack.i.bf16 %v2606_v18, %v1660_v23  ;;  %v2621_v32 = vunpack.i.h.bf16 %v2619_v30  ;;  %v2620_v33 = vunpack.i.l.bf16 %v2619_v30  ;;  %v1955_v23 = vld [vmem:[#allocation9 + $0x28] sm:$0xff]  ;;  %v1974_v30 = vld [vmem:[#allocation9 + $0xc0] sm:$0xff] }
 0x909   : > { %v2611_v26 = vunpack.i.h.bf16 %v2609_v24  ;;  %v2610_v27 = vunpack.i.l.bf16 %v2609_v24  ;;  %1828 = vrot.lane.b32.xlu1 %v1808_v25, %s2897_s8  ;;  %2643 = vrot.lane.b32.xlu0 %v2642_v22, %s2892_s29  ;;  %v1954_v22 = vld [vmem:[#allocation9 + $0x20] sm:$0xff]  ;;  %v1972_v24 = vld [vmem:[#allocation9 + $0xb0] sm:$0xff]  ;;  %v1973_v25 = vld [vmem:[#allocation9 + $0xb8] sm:$0xff] }
 0x90a   : > { %v1815_v35 = vsel %vm337_vm2, %v2620_v33, %v2621_v32  ;;  %v2672_v46 = vpack.i.bf16 %v2620_v33, %v1803_v42  ;;  %v1978_v42 = vld [vmem:[#allocation9 + $0xe0] sm:$0xff] }
 0x90b   : > { %v1666_v29 = vsel %vm1665_vm0, %v2610_v27, %v2611_v26  ;;  %v2652_v34 = vpack.i.bf16 %v2615_v16, %v2610_v27  ;;  %v2662_v36 = vpack.i.bf16 %v2621_v32, %v1815_v35  ;;  %v2629_v38 = vpop.permute.xlu0 %2628  ;;  %v1970_v16 = vld [vmem:[#allocation9 + $0xa0] sm:$0xff]  ;;  %v2453_v27 = vpack.c.bf16 %v1973_v25, %v1972_v24  ;;  %v1959_v35 = vld [vmem:[#allocation9 + $0x48] sm:$0xff] }
 0x90c   : > { %v2647_v31 = vpack.i.bf16 %v2611_v26, %v1666_v29  ;;  %v2631_v50 = vunpack.i.h.bf16 %v2629_v38  ;;  %v2630_v51 = vunpack.i.l.bf16 %v2629_v38  ;;  %v2451_v26 = vpack.c.bf16 %v1955_v23, %v1954_v22  ;;  %v1957_v29 = vld [vmem:[#allocation9 + $0x38] sm:$0xff] }
 0x90d   : > { %2638 = vrot.lane.b32.xlu1 %v2637_v28, %s2892_s29  ;;  %2658 = vrot.lane.b32.xlu0 %v2617_v61, %s2892_s29  ;;  %v2443_v61 = vpack.c.bf16 %v1951_v62, %v1950_v5  ;;  %v1956_v28 = vld [vmem:[#allocation9 + $0x30] sm:$0xff] }
 0x90e   : > { %v1830_v45 = vsel %vm891_vm13, %v2630_v51, %v2631_v50  ;;  %v2455_v32 = vpack.c.bf16 %v1957_v29, %v1956_v28 }
 0x90f   : > { %v2634_v48 = vpop.permute.xlu0 %2633  ;;  %2444 = vmatpush3.bf16.msra.mxu0 %v2443_v61 }
 0x910   : > { %v2636_v59 = vunpack.i.h.bf16 %v2634_v48  ;;  %v2635_v60 = vunpack.i.l.bf16 %v2634_v48  ;;  %2446 = vmatprep.subr.bf16.mxu0 %v2445_v2  ;;  %v1962_v48 = vld [vmem:[#allocation9 + $0x60] sm:$0xff] }
 0x911   : > { %2648 = vrot.lane.b32.xlu1 %v2647_v31, %s2892_s29  ;;  %v1975_v31 = vld [vmem:[#allocation9 + $0xc8] sm:$0xff] }
 0x912   : > { %v1704_v14 = vsel %vm280_vm1, %v2635_v60, %v2636_v59  ;;  %v2457_v33 = vpack.c.bf16 %v1975_v31, %v1974_v30 }
 0x913   : > { %2448 = vmatpush3.bf16.msra.mxu0 %v2447_v20 }
 0x915   : > { %2653 = vrot.lane.b32.xlu1 %v2652_v34, %s2892_s29  ;;  %v1958_v34 = vld [vmem:[#allocation9 + $0x40] sm:$0xff] }
 0x916   : > { %v2459_v38 = vpack.c.bf16 %v1959_v35, %v1958_v34 }
 0x919   : > { %2663 = vrot.lane.b32.xlu1 %v2662_v36, %s2892_s29  ;;  %v1976_v36 = vld [vmem:[#allocation9 + $0xd0] sm:$0xff] }
 0x970   : > { %v1673_v37 = vpop.permute.xlu1 %1672 }
 0x971   : > { %v1675_v39 = vsel %vm891_vm13, %v2616_v15, %v1673_v37  ;;  %v1977_v37 = vld [vmem:[#allocation9 + $0xd8] sm:$0xff] }
 0x972   : > { %v2667_v40 = vpack.i.bf16 %v1675_v39, %v1674_v21  ;;  %v2449_v21 = vpack.c.bf16 %v1971_v17, %v1970_v16  ;;  %v2461_v39 = vpack.c.bf16 %v1977_v37, %v1976_v36  ;;  %v1964_v36 = vld [vmem:[#allocation9 + $0x70] sm:$0xff]  ;;  %v1965_v37 = vld [vmem:[#allocation9 + $0x78] sm:$0xff] }
 0x974   : > { %v2624_v41 = vpop.permute.xlu1 %2623  ;;  %2668 = vrot.lane.b32.xlu0 %v2667_v40, %s2892_s29  ;;  %2450 = vmatprep.subr.bf16.mxu0 %v2449_v21  ;;  %v1960_v40 = vld [vmem:[#allocation9 + $0x50] sm:$0xff] }
 0x975   : > { %v2626_v43 = vunpack.i.h.bf16 %v2624_v41  ;;  %v2625_v44 = vunpack.i.l.bf16 %v2624_v41  ;;  %2452 = vmatpush3.bf16.msra.mxu0 %v2451_v26  ;;  %v1961_v41 = vld [vmem:[#allocation9 + $0x58] sm:$0xff] }
 0x976   : > { %2454 = vmatprep.subr.bf16.mxu0 %v2453_v27  ;;  %v1677_v27 = vld [vmem:[#allocation8 + $0x8] sm:$0xff] }
 0x977   : > { %v1820_v49 = vsel %vm1665_vm0, %v2625_v44, %v2626_v43  ;;  %v2687_v57 = vpack.i.bf16 %v2630_v51, %v2625_v44  ;;  %v2463_v44 = vpack.c.bf16 %v1961_v41, %v1960_v40  ;;  %v1981_v51 = vld [vmem:[#allocation9 + $0xf8] sm:$0x7f] }
 0x978   : > { %v2677_v52 = vpack.i.bf16 %v2626_v43, %v1820_v49  ;;  %2673 = vrot.lane.b32.xlu0 %v2672_v46, %s2892_s29  ;;  %v1979_v43 = vld [vmem:[#allocation9 + $0xe8] sm:$0xff] }
 0x979   : > { %2456 = vmatpush3.bf16.msra.mxu0 %v2455_v32  ;;  %v2465_v46 = vpack.c.bf16 %v1979_v43, %v1978_v42  ;;  %v1963_v49 = vld [vmem:[#allocation9 + $0x68] sm:$0xff] }
 0x97a   : > { %2678 = vrot.lane.b32.xlu1 %v2677_v52, %s2892_s29  ;;  %2458 = vmatprep.subr.bf16.mxu0 %v2457_v33  ;;  %v2467_v52 = vpack.c.bf16 %v1963_v49, %v1962_v48 }
 0x97b   : > { %v1829_v53 = vpop.permute.xlu1 %1828  ;;  %v2644_v55 = vpop.permute.xlu0 %2643 }
 0x97c   : > { %v1831_v47 = vsel %vm891_vm13, %v2631_v50, %v1829_v53  ;;  %v2645_v63 = vunpack.i.l.bf16 %v2644_v55  ;;  %v2646_v6 = vunpack.i.h.bf16 %v2644_v55  ;;  %v1980_v50 = vld [vmem:[#allocation9 + $0xf0] sm:$0xff]  ;;  %vm1994_vm13 = vcmask 1046528  }
 0x97d   : > { %v2682_v58 = vpack.i.bf16 %v1831_v47, %v1830_v45  ;;  %2460 = vmatpush3.bf16.msra.mxu0 %v2459_v38  ;;  %v2469_v53 = vpack.c.bf16 %v1981_v51, %v1980_v50  ;;  %vm2470_vm7 = vmpackc.low %vm1994_vm13, %vm2904_vm6  ;;  %v2472_v38 = vpack.c.bf16 %v1965_v37, %v1964_v36 }
 0x97e   : > { %2688 = vrot.lane.b32.xlu1 %v2687_v57, %s2892_s29  ;;  %v1703_v12 = vsel %vm280_vm1, %v2645_v63, %v2635_v60  ;;  %2462 = vmatprep.subr.bf16.mxu0 %v2461_v39 }
 0x97f   : > { %v2639_v1 = vpop.permute.xlu1 %2638  ;;  %2683 = vrot.lane.b32.xlu0 %v2682_v58, %s2892_s29  ;;  %v2659_v45 = vpop.permute.xlu0 %2658  ;;  %s2810_s29 = sshll.u32 %s2905_s19, 4  ;;  %s2811_s29 = int_to_ptr.vmem [resolvable:$false] %s2810_s29 }
 0x980   : > { %v2641_v8 = vunpack.i.h.bf16 %v2639_v1  ;;  %v2640_v9 = vunpack.i.l.bf16 %v2639_v1  ;;  %v2661_v3 = vunpack.i.h.bf16 %v2659_v45  ;;  %v2660_v5 = vunpack.i.l.bf16 %v2659_v45  ;;  %s2812_s6 = scalar_lea.vmem %s2811_s29, 1024  ;;  %p2813_p12 = scmp.lt.s32.totalorder %s3435_s5, %s2811_s29 }
 0x981   : > { %2464 = vmatpush3.bf16.msra.mxu0 %v2463_v44  ;;  %p2814_p1 = scmp.lt.s32.totalorder %s2812_s6, %s2806_s21 }
 0x982   : > { %v1705_v13 = vsel %vm280_vm1, %v2646_v6, %v2640_v9  ;;  %v1706_v15 = vsel %vm280_vm1, %v2640_v9, %v2641_v8  ;;  %2466 = vmatprep.subr.bf16.mxu0 %v2465_v46 }
 0x983   : > { %v2427_v18 = vpack.c.bf16 %v1705_v13, %v1703_v12  ;;  %v2425_v19 = vpack.c.bf16 %v1706_v15, %v1704_v14  ;;  %v2649_v55 = vpop.permute.xlu1 %2648  ;;  %v1858_v14 = vsel %vm280_vm1, %v2660_v5, %v2661_v3  ;;  %p2815_p2 = por %p2814_p1, %p2813_p12 }
 0x984   : > { %v2651_v58 = vunpack.i.h.bf16 %v2649_v55  ;;  %v2650_v59 = vunpack.i.l.bf16 %v2649_v55 }
 0x985   : > { %2426 = vmatprep.subr.bf16.mxu1 %v2425_v19  ;;  %2468 = vmatpush3.bf16.msra.mxu0 %v2467_v52  ;;  %v1676_v19 = vld [vmem:[#allocation8] sm:$0xff]  ;;  %p2816_p4 = pnand %p2815_p2, %p2809_p7 }
 0x986   : > { %2428 = vmatpush1.bf16.msra.mxu1 %v2427_v18  ;;  %2471 = vmatprep.subr.msk.bf16.mxu0 %vm2470_vm7, %v2469_v53  ;;  %v1708_v62 = vsel %vm280_vm1, %v2650_v59, %v2651_v58 }
 0x987   : > { %v2654_v57 = vpop.permute.xlu1 %2653 }
 0x988   : > { %v2655_v60 = vunpack.i.l.bf16 %v2654_v57  ;;  %v2656_v6 = vunpack.i.h.bf16 %v2654_v57 }
 0x989   : > { %2473 = vmatpush3.bf16.msra.mxu0 %v2472_v38 }
 0x98a   : > { %v1707_v0 = vsel %vm280_vm1, %v2655_v60, %v2650_v59 }
 0x98b   : > { %v2664_v47 = vpop.permute.xlu1 %2663 }
 0x98c   : > { %v2666_v63 = vunpack.i.h.bf16 %v2664_v47  ;;  %v2665_v1 = vunpack.i.l.bf16 %v2664_v47 }
 0x98e   : > { %v1860_v61 = vsel %vm280_vm1, %v2665_v1, %v2666_v63 }
 0x98f   : > { %v2433_v16 = vpack.c.bf16 %v1860_v61, %v1858_v14 }
 0x9e6   : > { %v2669_v4 = vpop.permute.xlu0 %2668 }
 0x9e7   : > { %v2671_v8 = vunpack.i.h.bf16 %v2669_v4  ;;  %v2670_v9 = vunpack.i.l.bf16 %v2669_v4 }
 0x9e9   : > { %v1709_v10 = vsel %vm280_vm1, %v2656_v6, %v2670_v9  ;;  %v1710_v11 = vsel %vm280_vm1, %v2670_v9, %v2671_v8 }
 0x9ea   : > { %v2431_v2 = vpack.c.bf16 %v1709_v10, %v1707_v0  ;;  %v2674_v54 = vpop.permute.xlu0 %2673  ;;  %v2429_v56 = vpack.c.bf16 %v1710_v11, %v1708_v62 }
 0x9eb   : > { %v2676_v12 = vunpack.i.h.bf16 %v2674_v54  ;;  %v2675_v13 = vunpack.i.l.bf16 %v2674_v54 }
 0x9ec   : > { %2430 = vmatprep.subr.bf16.mxu1 %v2429_v56  ;;  %v2679_v15 = vpop.permute.xlu1 %2678 }
 0x9ed   : > { %v1859_v17 = vsel %vm280_vm1, %v2676_v12, %v2665_v1  ;;  %v1857_v18 = vsel %vm280_vm1, %v2675_v13, %v2660_v5  ;;  %2432 = vmatpush1.bf16.msra.mxu1 %v2431_v2  ;;  %v2681_v21 = vunpack.i.h.bf16 %v2679_v15  ;;  %v2680_v22 = vunpack.i.l.bf16 %v2679_v15 }
 0x9ee   : > { %v2435_v20 = vpack.c.bf16 %v1859_v17, %v1857_v18  ;;  %2434 = vmatprep.subr.bf16.mxu1 %v2433_v16 }
 0x9ef   : > { %v1862_v32 = vsel %vm280_vm1, %v2680_v22, %v2681_v21 }
 0x9f0   : > { %v2689_v23 = vpop.permute.xlu1 %2688  ;;  %2252 = vmatmul.mubr.msk.f32.vlgmr.msra.gmra.mrb[18].mxu1 %vm1719_vm8, %v1676_v19 }
 0x9f1   : > { %v2691_v24 = vunpack.i.h.bf16 %v2689_v23  ;;  %v2690_v25 = vunpack.i.l.bf16 %v2689_v23  ;;  %v2684_v26 = vpop.permute.xlu0 %2683  ;;  %2436 = vmatpush1.bf16.msra.mxu1 %v2435_v20  ;;  %1796 = vmatprep.mubr.f32.mxu1 %v2894_v7 }
 0x9f2   : > { %v2686_v28 = vunpack.i.h.bf16 %v2684_v26  ;;  %v2685_v29 = vunpack.i.l.bf16 %v2684_v26 }
 0x9f3   : > { %v1861_v30 = vsel %vm280_vm1, %v2690_v25, %v2680_v22 }
 0x9f4   : > { %v1863_v31 = vsel %vm280_vm1, %v2691_v24, %v2685_v29  ;;  %2253 = vmatmul.mubr.msk.f32.gmra.mrb[20].mxu1 %vm1719_vm8, %v1677_v27  ;;  %v1864_v33 = vsel %vm280_vm1, %v2685_v29, %v2686_v28 }
 0x9f5   : > { %v2439_v34 = vpack.c.bf16 %v1863_v31, %v1861_v30  ;;  %v2437_v35 = vpack.c.bf16 %v1864_v33, %v1862_v32  ;;  %1937 = vmatprep.mubr.f32.mxu1 %v2894_v7 }
 0x9f7   : > { %2438 = vmatprep.subr.bf16.mxu1 %v2437_v35 }
 0x9f8   : > { %2440 = vmatpush1.bf16.msra.mxu1 %v2439_v34 }
 0x9fb   : > { %2254 = vmatmul.mubr.msk.f32.vlgmr.msra.gmra.mrb[22].mxu1 %vm1719_vm8, %v1676_v19 }
 0x9fc   : > { %1943 = vmatprep.mubr.f32.mxu1 %v2894_v7 }
 0x9ff   : > { %2255 = vmatmul.mubr.msk.f32.gmra.mrb[24].mxu1 %vm1719_vm8, %v1677_v27 }
 0xac3   : > { %v1792_v39 = vpop.f32.mrb[18].mxu1 }
 0xac4   : > { %v1794_v40 = vpop.f32.mrb[19].mxu1 }
 0xac5   : > { %2257 = vmatprep.mubr.msk.f32.mxu0 %vm337_vm2, %v1794_v40 }
 0xac6   : > { %2063 = vmatmul.mubr.f32.vlgmr.msra.gmra.mrb[10].mxu0 %v1792_v39 }
 0xac7   : > { %v1798_v41 = vpop.f32.mrb[20].mxu1 }
 0xac8   : > { %v1800_v42 = vpop.f32.mrb[21].mxu1 }
 0xac9   : > { %2258 = vmatprep.mubr.msk.f32.mxu0 %vm337_vm2, %v1800_v42 }
 0xaca   : > { %2068 = vmatmul.mubr.f32.gmra.mrb[12].mxu0 %v1798_v41 }
 0xace   : > { %v1939_v43 = vpop.f32.mrb[22].mxu1 }
 0xacf   : > { %v1941_v44 = vpop.f32.mrb[23].mxu1 }
 0xad0   : > { %2259 = vmatprep.mubr.msk.f32.mxu0 %vm337_vm2, %v1941_v44 }
 0xad1   : > { %2073 = vmatmul.mubr.f32.gmra.mrb[14].mxu0 %v1939_v43 }
 0xad2   : > { %v1945_v7 = vpop.f32.mrb[24].mxu1 }
 0xad3   : > { %v1947_v46 = vpop.f32.mrb[25].mxu1 }
 0xad4   : > { %2260 = vmatprep.mubr.msk.f32.mxu0 %vm337_vm2, %v1947_v46 }
 0xad5   : > { %2078 = vmatmul.mubr.f32.gmra.mrb[16].mxu0 %v1945_v7 }
 0xb99   : > { %v2325_v48 = vpop.f32.mrb[10].mxu0 }
 0xb9a   : > { %v2326_v49 = vpop.f32.mrb[11].mxu0 }
 0xb9b   : > { %v2327_v50 = vadd.f32 %v2326_v49, %v2325_v48 }
 0xb9d   : > { %2083 = vst [vmem:[%s260_s20] sm:$0xff] %v2327_v50  ;;  %v2328_v51 = vpop.f32.mrb[12].mxu0 }
 0xb9e   : > { %v2329_v52 = vpop.f32.mrb[13].mxu0 }
 0xb9f   : > { %v2330_v53 = vadd.f32 %v2329_v52, %v2328_v51 }
 0xba1   : > { %2084 = vst [vmem:[%s260_s20 + $0x8] sm:$0xff] %v2330_v53 }
 0xba4   : > { %v2331_v55 = vpop.f32.mrb[14].mxu0 }
 0xba5   : > { %v2332_v57 = vpop.f32.mrb[15].mxu0 }
 0xba6   : > { %v2333_v45 = vadd.f32 %v2332_v57, %v2331_v55 }
 0xba8   : > { %2261 = vst [vmem:[%s260_s20 + $0x10] sm:$0xff] %v2333_v45  ;;  %v2334_v47 = vpop.f32.mrb[16].mxu0 }
 0xba9   : > { %v2335_v58 = vpop.f32.mrb[17].mxu0 }
 0xbaa   : > { %v2336_v59 = vadd.f32 %v2335_v58, %v2334_v47 }
 0xbac   : > { %2262 = vst [vmem:[%s260_s20 + $0x18] sm:$0xff] %v2336_v59 }
 0xbad   : > { %2819 = shalt.err (!%p2816_p4)
}
 0xbae   : > { %s2820_s7 = scalar_lea.hbm %s3440_s25, 512  ;;  %s2824_s24 = scalar_lea.hbm %s3488_s4, 1024 }
 0xbaf   : > { %p2821_p9 = scmp.ne.s32.totalorder %s3440_s25, %s2820_s7  ;;  %p2825_p8 = scmp.lt.u32.totalorder %s3440_s25, %s3488_s4 }
 0xbb0   : > { %p2826_p13 = scmp.lt.u32.totalorder %s2824_s24, %s2820_s7  ;;  %p2828_p10 = scmp.lt.u32.totalorder %s2820_s7, %s3440_s25 }
 0xbb1   : > { %p2822_p0 = pnand %p2821_p9, %p3087_p5 }
 0xbb2   : > { %p2827_p6 = por %p2826_p13, %p2825_p8 }
 0xbb3   : > { %p2823_p11 = pneg %p2822_p0 }
 0xbb4   : > { %p2829_p3 = por %p2828_p10, %p2827_p6 }
 0xbb6   : > { %p2830_p7 = pnand %p2829_p3, %p2823_p11 }
 0xbb8   : > { %2833 = shalt.err (!%p2830_p7)
}
 0xbb9   : > { %s2906_s20 = smov 128   ;;  %s2907_s9 = smov 8  }
 0xbba   : > { %2488 = dma.vmem_to_hbm [thread:$0]  (%p3087_p5), %s3435_s5, 512, %s3440_s25, %s2089_s23, %s2906_s20, %s2906_s20, %s2907_s9  }
 0xbbb PF: > { %s2118_s11 = sand.u32 1, %s2868_s15   ;;  %p3508_p12 = scmp.ne.s32.totalorder %s3493_s22, 0 }
 0xbbc   : > { %p3509_p1 = scmp.ge.s32.totalorder %s2880_s18, 2  ;;  %s2119_s26 = scalar_lea.sflag [#allocation5], %s2118_s11 }
 0xbbe   : > { %p2505_p2 = pnand %p3509_p1, %p3508_p12 }
 0xbc0   : > { %2863 = dma.done.wait (!%p2505_p2), %s2119_s26, 512  }
 0xbc1   : > { %2865 = vsyncadd (!%p2505_p2), %s2119_s26, 4294966784  ;;  %p19_p4 = scmp.ge.s32.totalorder %s3073_s10, 4   ;;  %s3510_s15 = smov %s2872_s16 }
 0xbc2   : > { %s3511_s16 = smov %s2876_s17  ;;  %s3512_s17 = smov %s3083_s12 }
 0xbc3   : > { %s3513_s18 = smov %s3073_s10  ;;  %21 = sbr.rel (!%p19_p4) target bundleno = 7 (0x7), region = 97 }
 0xbca   :  { %2124 = vsyncpa [#allocation4], 1 }
 0xbcb   :  { %2126 = vsyncpa [#allocation4 + $0x1], 1 }
 0xbcc   :  { %2127 = vsyncpa [#allocation7], 1 }
 0xbcd   :  { %2128 = vsyncpa [#allocation10], 1 }
 0xbce   :  { %2129 = vsyncpa [#allocation5], 1 }
 0xbcf   :  { %2131 = vsyncpa [#allocation5 + $0x1], 1 }

</bundles_post_ra>
